<compile_context>
chip_gen: v7x
topology: tpu7x:2x2x1
jax: 0.10.0
libtpu: 0.0.40
codegen_flags: <defaults>
</compile_context>

<pallas_src>
import math

import jax
import jax.numpy as jnp
from jax.experimental import pallas as pl
from jax.experimental.pallas import tpu as pltpu


def _make_fused_kernel(L, channels, bt):
    """Fused [Conv1d(k=7, s=2, p=3) + ReLU] x n for one batch tile of bt rows."""
    n = len(channels)

    def kernel(*refs):
        x_ref = refs[0]            # (L, bt, 1)   time-leading, batch on lanes
        o_ref = refs[-1]           # (C_last, L_last * bt)  lane-dense output
        wb = refs[1:-1]            # (w1, b1, w2, b2, ...): (7*C_in, C_out), (1, C_out)

        f32 = jnp.float32
        h = x_ref[...].astype(f32)              # (L, bt, 1)
        L_cur, C_in = L, 1
        acc = None

        for l in range(n):
            w_ref, b_ref = wb[2 * l], wb[2 * l + 1]
            C_out = channels[l]
            L_out = L_cur // 2

            # pad=3 on both sides of the time axis (leading axis -> cheap).
            zpad = jnp.zeros((3, bt, C_in), f32)
            h_pad = jnp.concatenate([zpad, h, zpad], axis=0)     # (L_cur+6, bt, C_in)

            # Polyphase split of the padded signal: e_ph[m] = x_pad[2m],
            # o_ph[m] = x_pad[2m+1].  Pure leading-axis reshape + slice ->
            # exact and free (no selection matmuls, no strided lane access).
            ph = h_pad.reshape(L_out + 3, 2, bt, C_in)
            e_ph = ph[:, 0]                                      # (L_out+3, bt, C_in)
            o_ph = ph[:, 1]

            # im2col over the 7 taps: tap k reads x_pad[2t + k], i.e.
            #   k = 2j   -> e_ph[t + j]
            #   k = 2j+1 -> o_ph[t + j]
            taps = []
            for k in range(7):
                src = e_ph if k % 2 == 0 else o_ph
                j = k // 2
                taps.append(src[j:j + L_out])                    # (L_out, bt, C_in)
            S = jnp.concatenate(taps, axis=2)                    # (L_out, bt, 7*C_in)
            S2 = S.reshape(L_out * bt, 7 * C_in)                 # rows = t*bt + b

            # Single MXU matmul per layer, f32 accumulate.
            # v6e/v7x knob: S2/w can be cast to bf16 here once shapes are big.
            acc = jnp.dot(S2, w_ref[...], preferred_element_type=f32)
            acc = jnp.maximum(acc + b_ref[...], 0.0)             # (L_out*bt, C_out)

            if l < n - 1:
                h = acc.reshape(L_out, bt, C_out)                # carry (time, batch, chan)
            L_cur, C_in = L_out, C_out

        # Lane-dense store: (L_last*bt, C_last) -> (C_last, L_last*bt).
        o_ref[...] = acc.T.astype(o_ref.dtype)

    return kernel


def _pick_batch_tile(B):
    # Batch tile == lane width of every in-kernel slab.  Use the full batch for
    # small B, otherwise 128-wide tiles: keeps BlockSpec tiling constraints
    # satisfied, keeps the fused activations well inside scoped VMEM (v7x has
    # only 64 MiB physical -- re-derive if L or D grows), and leaves >=2 grid
    # steps per TensorCore for large B so the "parallel" axis feeds both TCs.
    if B <= 128 or B % 128 != 0:
        return B
    return 128


def v2i_down_forward(x, params):
    """x: (B, L) float32 -> (B, 1, C_last, L_last), matching the PyTorch module."""
    B, L = x.shape
    channels = [w.shape[-1] for w, _ in params]
    n = len(channels)
    assert L % (2 ** n) == 0, "sequence length must be divisible by 2**num_layer"
    L_last = L >> n
    C_last = channels[-1]

    bt = _pick_batch_tile(B)
    n_tiles = B // bt

    # Wrapper-side layout plumbing (tiny): input presented time-leading with
    # the batch on the lane axis.
    x_t = jnp.transpose(x)[:, :, None]                   # (L, B, 1)

    args = [x_t]
    in_specs = [pl.BlockSpec((L, bt, 1), lambda i: (0, i, 0))]
    for w, b in params:
        K, C_in, C_out = w.shape
        # Pre-reshape weights to the im2col form (7*C_in, C_out), tap-major rows.
        args.append(w.reshape(K * C_in, C_out))
        args.append(b.reshape(1, C_out))
        in_specs.append(pl.BlockSpec((K * C_in, C_out), lambda i: (0, 0)))
        in_specs.append(pl.BlockSpec((1, C_out), lambda i: (0, 0)))

    out = pl.pallas_call(
        _make_fused_kernel(L, channels, bt),
        out_shape=jax.ShapeDtypeStruct((n_tiles, C_last, L_last * bt), x.dtype),
        grid=(n_tiles,),
        in_specs=in_specs,
        out_specs=pl.BlockSpec((None, C_last, L_last * bt), lambda i: (i, 0, 0)),
        compiler_params=pltpu.CompilerParams(
            dimension_semantics=("parallel",)   # v7x: the 2 TCs split the batch tiles
        ),
    )(*args)

    # (n_tiles, C_last, L_last*bt) -> (B, 1, C_last, L_last): layout plumbing only.
    out = out.reshape(n_tiles, C_last, L_last, bt)
    out = jnp.transpose(out, (0, 3, 1, 2)).reshape(B, 1, C_last, L_last)
    return out


def init_params(key, input_dim, num_layer=3):
    """Deterministic Conv1d params (mimics torch default init bounds).

    Weights stored tap-major: (K=7, C_in, C_out)."""
    params = []
    c_in = 1
    for i in range(num_layer):
        c_out = input_dim // (2 ** (i + 1))
        key, kw, kb = jax.random.split(key, 3)
        bound = 1.0 / math.sqrt(c_in * 7)
        w = jax.random.uniform(kw, (7, c_in, c_out), jnp.float32, -bound, bound)
        b = jax.random.uniform(kb, (c_out,), jnp.float32, -bound, bound)
        params.append((w, b))
        c_in = c_out
    return params


def reference_forward(x, params):
    """Pure-JAX reference using lax.conv_general_dilated (NCL layout, f32 HIGHEST)."""
    out = x[:, None, :]  # (B, 1, L)
    for w, b in params:
        w_oik = jnp.transpose(w, (2, 1, 0))  # (C_out, C_in, K)
        out = jax.lax.conv_general_dilated(
            out, w_oik, window_strides=(2,), padding=[(3, 3)],
            dimension_numbers=("NCH", "OIH", "NCH"),
            precision=jax.lax.Precision.HIGHEST,
        )
        out = jax.nn.relu(out + b[None, :, None])
    return out[:, None, :, :]


if __name__ == "__main__":
    input_dim = 32
    num_layer = 3
    B, L = 2, 64

    key = jax.random.PRNGKey(0)
    kx, kp = jax.random.split(key)
    x = jax.random.normal(kx, (B, L), jnp.float32)
    params = init_params(kp, input_dim, num_layer)

    out = jax.jit(lambda xx: v2i_down_forward(xx, params))(x)
    out = jax.block_until_ready(out)

    expected_shape = (B, 1, input_dim // 2 ** num_layer, L // 2 ** num_layer)
    assert out.shape == expected_shape, (out.shape, expected_shape)

    ref = reference_forward(x, params)
    # Conv matmuls run at DEFAULT MXU precision (data movement is now exact,
    # so accuracy is >= previous version); tolerance still budgets for a
    # bf16-operand MXU path.  Indexing/structural bugs would give O(0.1..1)
    # errors and are still caught.
    max_err = float(jnp.max(jnp.abs(out - ref)))
    assert jnp.allclose(out, ref, rtol=2e-2, atol=1e-2), max_err

    print("KERNEL_OK")
</pallas_src>

<mosaic_0001>
module attributes {stable_mosaic.version = 11 : i64} {
  func.func @kernel(%arg0: i32, %arg1: memref<64x2x1xf32, #tpu.memory_space<vmem>>, %arg2: memref<7x16xf32, #tpu.memory_space<vmem>>, %arg3: memref<1x16xf32, #tpu.memory_space<vmem>>, %arg4: memref<112x8xf32, #tpu.memory_space<vmem>>, %arg5: memref<1x8xf32, #tpu.memory_space<vmem>>, %arg6: memref<56x4xf32, #tpu.memory_space<vmem>>, %arg7: memref<1x4xf32, #tpu.memory_space<vmem>>, %arg8: memref<1x4x16xf32, #tpu.memory_space<vmem>>) attributes {dimension_semantics = [#tpu.dimension_semantics<parallel>], iteration_bounds = array<i64: 1>, scalar_prefetch = 0 : i64, scratch_operands = 0 : i64, tpu.core_type = #tpu.core_type<tc>, window_params = [{transform_indices = @transform_0, window_bounds = array<i64: 64, 2, 1>}, {pipeline_mode = #tpu.pipeline_mode<synchronous>, transform_indices = @transform_1, window_bounds = array<i64: 7, 16>}, {pipeline_mode = #tpu.pipeline_mode<synchronous>, transform_indices = @transform_2, window_bounds = array<i64: 1, 16>}, {pipeline_mode = #tpu.pipeline_mode<synchronous>, transform_indices = @transform_3, window_bounds = array<i64: 112, 8>}, {pipeline_mode = #tpu.pipeline_mode<synchronous>, transform_indices = @transform_4, window_bounds = array<i64: 1, 8>}, {pipeline_mode = #tpu.pipeline_mode<synchronous>, transform_indices = @transform_5, window_bounds = array<i64: 56, 4>}, {pipeline_mode = #tpu.pipeline_mode<synchronous>, transform_indices = @transform_6, window_bounds = array<i64: 1, 4>}, {transform_indices = @transform_7, window_bounds = array<i64: 1, 4, 16>}]} {
    %c0 = arith.constant 0 : index
    %c0_0 = arith.constant 0 : index
    %c0_1 = arith.constant 0 : index
    %0 = vector.load %arg1[%c0, %c0_0, %c0_1] : memref<64x2x1xf32, #tpu.memory_space<vmem>>, vector<64x2x1xf32>
    %cst = arith.constant 0.000000e+00 : f32
    %1 = vector.broadcast %cst : f32 to vector<3x2x1xf32>
    %2 = tpu.concatenate %1, %0, %1 in 0 : vector<3x2x1xf32>, vector<64x2x1xf32>, vector<3x2x1xf32> -> vector<70x2x1xf32>
    %3 = vector.shape_cast %2 : vector<70x2x1xf32> to vector<35x2x2x1xf32>
    %4 = vector.extract_strided_slice %3 {offsets = [0, 0, 0, 0], sizes = [35, 1, 2, 1], strides = [1, 1, 1, 1]} : vector<35x2x2x1xf32> to vector<35x1x2x1xf32>
    %5 = vector.shape_cast %4 : vector<35x1x2x1xf32> to vector<35x2x1xf32>
    %6 = vector.extract_strided_slice %3 {offsets = [0, 1, 0, 0], sizes = [35, 1, 2, 1], strides = [1, 1, 1, 1]} : vector<35x2x2x1xf32> to vector<35x1x2x1xf32>
    %7 = vector.shape_cast %6 : vector<35x1x2x1xf32> to vector<35x2x1xf32>
    %8 = vector.extract_strided_slice %5 {offsets = [0, 0, 0], sizes = [32, 2, 1], strides = [1, 1, 1]} : vector<35x2x1xf32> to vector<32x2x1xf32>
    %9 = vector.extract_strided_slice %7 {offsets = [0, 0, 0], sizes = [32, 2, 1], strides = [1, 1, 1]} : vector<35x2x1xf32> to vector<32x2x1xf32>
    %10 = vector.extract_strided_slice %5 {offsets = [1, 0, 0], sizes = [32, 2, 1], strides = [1, 1, 1]} : vector<35x2x1xf32> to vector<32x2x1xf32>
    %11 = vector.extract_strided_slice %7 {offsets = [1, 0, 0], sizes = [32, 2, 1], strides = [1, 1, 1]} : vector<35x2x1xf32> to vector<32x2x1xf32>
    %12 = vector.extract_strided_slice %5 {offsets = [2, 0, 0], sizes = [32, 2, 1], strides = [1, 1, 1]} : vector<35x2x1xf32> to vector<32x2x1xf32>
    %13 = vector.extract_strided_slice %7 {offsets = [2, 0, 0], sizes = [32, 2, 1], strides = [1, 1, 1]} : vector<35x2x1xf32> to vector<32x2x1xf32>
    %14 = vector.extract_strided_slice %5 {offsets = [3, 0, 0], sizes = [32, 2, 1], strides = [1, 1, 1]} : vector<35x2x1xf32> to vector<32x2x1xf32>
    %15 = tpu.concatenate %8, %9, %10, %11, %12, %13, %14 in 2 : vector<32x2x1xf32>, vector<32x2x1xf32>, vector<32x2x1xf32>, vector<32x2x1xf32>, vector<32x2x1xf32>, vector<32x2x1xf32>, vector<32x2x1xf32> -> vector<32x2x7xf32>
    %16 = vector.shape_cast %15 : vector<32x2x7xf32> to vector<64x7xf32>
    %c0_2 = arith.constant 0 : index
    %c0_3 = arith.constant 0 : index
    %17 = vector.load %arg2[%c0_2, %c0_3] : memref<7x16xf32, #tpu.memory_space<vmem>>, vector<7x16xf32>
    %cst_4 = arith.constant dense<0.000000e+00> : vector<64x16xf32>
    %18 = tpu.matmul %16, %17, %cst_4 {dimension_numbers = #tpu.dot_dimension_numbers<[1], [0], [0], [1], [0, 0, 1, 1], [], []>} : vector<64x7xf32>, vector<7x16xf32>, vector<64x16xf32> -> vector<64x16xf32>
    %c0_5 = arith.constant 0 : index
    %c0_6 = arith.constant 0 : index
    %19 = vector.load %arg3[%c0_5, %c0_6] : memref<1x16xf32, #tpu.memory_space<vmem>>, vector<1x16xf32>
    %20 = vector.broadcast %19 : vector<1x16xf32> to vector<64x16xf32>
    %21 = arith.addf %18, %20 : vector<64x16xf32>
    %cst_7 = arith.constant 0.000000e+00 : f32
    %22 = vector.broadcast %cst_7 : f32 to vector<64x16xf32>
    %23 = arith.maximumf %21, %22 : vector<64x16xf32>
    %24 = vector.shape_cast %23 : vector<64x16xf32> to vector<32x2x16xf32>
    %cst_8 = arith.constant 0.000000e+00 : f32
    %25 = vector.broadcast %cst_8 : f32 to vector<3x2x16xf32>
    %26 = tpu.concatenate %25, %24, %25 in 0 : vector<3x2x16xf32>, vector<32x2x16xf32>, vector<3x2x16xf32> -> vector<38x2x16xf32>
    %27 = vector.shape_cast %26 : vector<38x2x16xf32> to vector<19x2x2x16xf32>
    %28 = vector.extract_strided_slice %27 {offsets = [0, 0, 0, 0], sizes = [19, 1, 2, 16], strides = [1, 1, 1, 1]} : vector<19x2x2x16xf32> to vector<19x1x2x16xf32>
    %29 = vector.shape_cast %28 : vector<19x1x2x16xf32> to vector<19x2x16xf32>
    %30 = vector.extract_strided_slice %27 {offsets = [0, 1, 0, 0], sizes = [19, 1, 2, 16], strides = [1, 1, 1, 1]} : vector<19x2x2x16xf32> to vector<19x1x2x16xf32>
    %31 = vector.shape_cast %30 : vector<19x1x2x16xf32> to vector<19x2x16xf32>
    %32 = vector.extract_strided_slice %29 {offsets = [0, 0, 0], sizes = [16, 2, 16], strides = [1, 1, 1]} : vector<19x2x16xf32> to vector<16x2x16xf32>
    %33 = vector.extract_strided_slice %31 {offsets = [0, 0, 0], sizes = [16, 2, 16], strides = [1, 1, 1]} : vector<19x2x16xf32> to vector<16x2x16xf32>
    %34 = vector.extract_strided_slice %29 {offsets = [1, 0, 0], sizes = [16, 2, 16], strides = [1, 1, 1]} : vector<19x2x16xf32> to vector<16x2x16xf32>
    %35 = vector.extract_strided_slice %31 {offsets = [1, 0, 0], sizes = [16, 2, 16], strides = [1, 1, 1]} : vector<19x2x16xf32> to vector<16x2x16xf32>
    %36 = vector.extract_strided_slice %29 {offsets = [2, 0, 0], sizes = [16, 2, 16], strides = [1, 1, 1]} : vector<19x2x16xf32> to vector<16x2x16xf32>
    %37 = vector.extract_strided_slice %31 {offsets = [2, 0, 0], sizes = [16, 2, 16], strides = [1, 1, 1]} : vector<19x2x16xf32> to vector<16x2x16xf32>
    %38 = vector.extract_strided_slice %29 {offsets = [3, 0, 0], sizes = [16, 2, 16], strides = [1, 1, 1]} : vector<19x2x16xf32> to vector<16x2x16xf32>
    %39 = tpu.concatenate %32, %33, %34, %35, %36, %37, %38 in 2 : vector<16x2x16xf32>, vector<16x2x16xf32>, vector<16x2x16xf32>, vector<16x2x16xf32>, vector<16x2x16xf32>, vector<16x2x16xf32>, vector<16x2x16xf32> -> vector<16x2x112xf32>
    %40 = vector.shape_cast %39 : vector<16x2x112xf32> to vector<32x112xf32>
    %c0_9 = arith.constant 0 : index
    %c0_10 = arith.constant 0 : index
    %41 = vector.load %arg4[%c0_9, %c0_10] : memref<112x8xf32, #tpu.memory_space<vmem>>, vector<112x8xf32>
    %cst_11 = arith.constant dense<0.000000e+00> : vector<32x8xf32>
    %42 = tpu.matmul %40, %41, %cst_11 {dimension_numbers = #tpu.dot_dimension_numbers<[1], [0], [0], [1], [0, 0, 1, 1], [], []>} : vector<32x112xf32>, vector<112x8xf32>, vector<32x8xf32> -> vector<32x8xf32>
    %c0_12 = arith.constant 0 : index
    %c0_13 = arith.constant 0 : index
    %43 = vector.load %arg5[%c0_12, %c0_13] : memref<1x8xf32, #tpu.memory_space<vmem>>, vector<1x8xf32>
    %44 = vector.broadcast %43 : vector<1x8xf32> to vector<32x8xf32>
    %45 = arith.addf %42, %44 : vector<32x8xf32>
    %cst_14 = arith.constant 0.000000e+00 : f32
    %46 = vector.broadcast %cst_14 : f32 to vector<32x8xf32>
    %47 = arith.maximumf %45, %46 : vector<32x8xf32>
    %48 = vector.shape_cast %47 : vector<32x8xf32> to vector<16x2x8xf32>
    %cst_15 = arith.constant 0.000000e+00 : f32
    %49 = vector.broadcast %cst_15 : f32 to vector<3x2x8xf32>
    %50 = tpu.concatenate %49, %48, %49 in 0 : vector<3x2x8xf32>, vector<16x2x8xf32>, vector<3x2x8xf32> -> vector<22x2x8xf32>
    %51 = vector.shape_cast %50 : vector<22x2x8xf32> to vector<11x2x2x8xf32>
    %52 = vector.extract_strided_slice %51 {offsets = [0, 0, 0, 0], sizes = [11, 1, 2, 8], strides = [1, 1, 1, 1]} : vector<11x2x2x8xf32> to vector<11x1x2x8xf32>
    %53 = vector.shape_cast %52 : vector<11x1x2x8xf32> to vector<11x2x8xf32>
    %54 = vector.extract_strided_slice %51 {offsets = [0, 1, 0, 0], sizes = [11, 1, 2, 8], strides = [1, 1, 1, 1]} : vector<11x2x2x8xf32> to vector<11x1x2x8xf32>
    %55 = vector.shape_cast %54 : vector<11x1x2x8xf32> to vector<11x2x8xf32>
    %56 = vector.extract_strided_slice %53 {offsets = [0, 0, 0], sizes = [8, 2, 8], strides = [1, 1, 1]} : vector<11x2x8xf32> to vector<8x2x8xf32>
    %57 = vector.extract_strided_slice %55 {offsets = [0, 0, 0], sizes = [8, 2, 8], strides = [1, 1, 1]} : vector<11x2x8xf32> to vector<8x2x8xf32>
    %58 = vector.extract_strided_slice %53 {offsets = [1, 0, 0], sizes = [8, 2, 8], strides = [1, 1, 1]} : vector<11x2x8xf32> to vector<8x2x8xf32>
    %59 = vector.extract_strided_slice %55 {offsets = [1, 0, 0], sizes = [8, 2, 8], strides = [1, 1, 1]} : vector<11x2x8xf32> to vector<8x2x8xf32>
    %60 = vector.extract_strided_slice %53 {offsets = [2, 0, 0], sizes = [8, 2, 8], strides = [1, 1, 1]} : vector<11x2x8xf32> to vector<8x2x8xf32>
    %61 = vector.extract_strided_slice %55 {offsets = [2, 0, 0], sizes = [8, 2, 8], strides = [1, 1, 1]} : vector<11x2x8xf32> to vector<8x2x8xf32>
    %62 = vector.extract_strided_slice %53 {offsets = [3, 0, 0], sizes = [8, 2, 8], strides = [1, 1, 1]} : vector<11x2x8xf32> to vector<8x2x8xf32>
    %63 = tpu.concatenate %56, %57, %58, %59, %60, %61, %62 in 2 : vector<8x2x8xf32>, vector<8x2x8xf32>, vector<8x2x8xf32>, vector<8x2x8xf32>, vector<8x2x8xf32>, vector<8x2x8xf32>, vector<8x2x8xf32> -> vector<8x2x56xf32>
    %64 = vector.shape_cast %63 : vector<8x2x56xf32> to vector<16x56xf32>
    %c0_16 = arith.constant 0 : index
    %c0_17 = arith.constant 0 : index
    %65 = vector.load %arg6[%c0_16, %c0_17] : memref<56x4xf32, #tpu.memory_space<vmem>>, vector<56x4xf32>
    %cst_18 = arith.constant dense<0.000000e+00> : vector<16x4xf32>
    %66 = tpu.matmul %64, %65, %cst_18 {dimension_numbers = #tpu.dot_dimension_numbers<[1], [0], [0], [1], [0, 0, 1, 1], [], []>} : vector<16x56xf32>, vector<56x4xf32>, vector<16x4xf32> -> vector<16x4xf32>
    %c0_19 = arith.constant 0 : index
    %c0_20 = arith.constant 0 : index
    %67 = vector.load %arg7[%c0_19, %c0_20] : memref<1x4xf32, #tpu.memory_space<vmem>>, vector<1x4xf32>
    %68 = vector.broadcast %67 : vector<1x4xf32> to vector<16x4xf32>
    %69 = arith.addf %66, %68 : vector<16x4xf32>
    %cst_21 = arith.constant 0.000000e+00 : f32
    %70 = vector.broadcast %cst_21 : f32 to vector<16x4xf32>
    %71 = arith.maximumf %69, %70 : vector<16x4xf32>
    %72 = tpu.transpose %71, [1, 0] : vector<16x4xf32> -> vector<4x16xf32>
    %c0_22 = arith.constant 0 : index
    %c0_23 = arith.constant 0 : index
    %c0_24 = arith.constant 0 : index
    %73 = vector.load %arg8[%c0_22, %c0_23, %c0_24] : memref<1x4x16xf32, #tpu.memory_space<vmem>>, vector<1x4x16xf32>
    %74 = vector.shape_cast %73 : vector<1x4x16xf32> to vector<4x16xf32>
    %75 = vector.shape_cast %72 : vector<4x16xf32> to vector<1x4x16xf32>
    tpu.vector_store %arg8[%c0_22, %c0_23, %c0_24], %75 {strides = array<i32>} : memref<1x4x16xf32, #tpu.memory_space<vmem>>, vector<1x4x16xf32>,
    return
  }
  func.func @transform_0(%arg0: i32) -> (i32, i32, i32) {
    %c0_i32 = arith.constant 0 : i32
    %c0_i32_0 = arith.constant 0 : i32
    %c0_i32_1 = arith.constant 0 : i32
    return %c0_i32, %arg0, %c0_i32_0 : i32, i32, i32
  }
  func.func @transform_1(%arg0: i32) -> (i32, i32) {
    %c0_i32 = arith.constant 0 : i32
    %c0_i32_0 = arith.constant 0 : i32
    %c0_i32_1 = arith.constant 0 : i32
    return %c0_i32, %c0_i32_0 : i32, i32
  }
  func.func @transform_2(%arg0: i32) -> (i32, i32) {
    %c0_i32 = arith.constant 0 : i32
    %c0_i32_0 = arith.constant 0 : i32
    %c0_i32_1 = arith.constant 0 : i32
    return %c0_i32, %c0_i32_0 : i32, i32
  }
  func.func @transform_3(%arg0: i32) -> (i32, i32) {
    %c0_i32 = arith.constant 0 : i32
    %c0_i32_0 = arith.constant 0 : i32
    %c0_i32_1 = arith.constant 0 : i32
    return %c0_i32, %c0_i32_0 : i32, i32
  }
  func.func @transform_4(%arg0: i32) -> (i32, i32) {
    %c0_i32 = arith.constant 0 : i32
    %c0_i32_0 = arith.constant 0 : i32
    %c0_i32_1 = arith.constant 0 : i32
    return %c0_i32, %c0_i32_0 : i32, i32
  }
  func.func @transform_5(%arg0: i32) -> (i32, i32) {
    %c0_i32 = arith.constant 0 : i32
    %c0_i32_0 = arith.constant 0 : i32
    %c0_i32_1 = arith.constant 0 : i32
    return %c0_i32, %c0_i32_0 : i32, i32
  }
  func.func @transform_6(%arg0: i32) -> (i32, i32) {
    %c0_i32 = arith.constant 0 : i32
    %c0_i32_0 = arith.constant 0 : i32
    %c0_i32_1 = arith.constant 0 : i32
    return %c0_i32, %c0_i32_0 : i32, i32
  }
  func.func @transform_7(%arg0: i32) -> (i32, i32, i32) {
    %c0_i32 = arith.constant 0 : i32
    %c0_i32_0 = arith.constant 0 : i32
    %c0_i32_1 = arith.constant 0 : i32
    return %arg0, %c0_i32, %c0_i32_0 : i32, i32, i32
  }
}

</mosaic_0001>

<bundles_post_ra>
// kernel: _lambda_.1
= control target key start
LH: loop header
LB: loop body
LE: loop exit
PB: predicated region body
PF: predicated region fallthrough
CT: control target
= control target key end

     0   :  { %12 = vsyncpa [#allocation3], 0  ;;  %s2653_s24 = smov [#allocation2]   ;;  %s4868_s0 = inlined_call_operand.vmem [shape: f32[64,2,1], index: 0, kind: input, shape index: {}]   ;;  %s4869_s1 = inlined_call_operand.vmem [shape: f32[7,16], index: 1, kind: input, shape index: {}]   ;;  %s4870_s2 = inlined_call_operand.vmem [shape: f32[1,16], index: 2, kind: input, shape index: {}]   ;;  %s4871_s3 = inlined_call_operand.vmem [shape: f32[112,8], index: 3, kind: input, shape index: {}]   ;;  %s4872_s4 = inlined_call_operand.vmem [shape: f32[1,8], index: 4, kind: input, shape index: {}]   ;;  %s4873_s5 = inlined_call_operand.hbm [shape: f32[56,4], index: 5, kind: input, shape index: {}]   ;;  %s4874_s6 = inlined_call_operand.vmem [shape: f32[1,4], index: 6, kind: input, shape index: {}]   ;;  %s4875_s7 = inlined_call_operand.vmem [shape: f32[1,4,16], index: 7, kind: output, shape index: {}]  }
   0x1   :  { %s28_s25 = sshll.u32 %s2653_s24, 4  ;;  %s2629_s28 = scalar_lea.hbm %s4873_s5, 896  ;;  %s29_s25 = int_to_ptr.vmem [resolvable:$true] %s28_s25 }
   0x2   :  { %p2630_p0 = scmp.ne.s32.totalorder %s4873_s5, %s2629_s28  ;;  %p2633_p1 = scmp.lt.u32.totalorder %s2629_s28, %s4873_s5 }
   0x4   :  { %p2635_p2 = pnand %p2633_p1, %p2630_p0 }
   0x6   :  { %2638 = shalt.err (!%p2635_p2)
}
   0x7   :  { %s2639_s10 = scalar_lea.vmem %s29_s25, 896  ;;  %p2644_p4 = scmp.lt.s32.totalorder %s29_s25, %s29_s25 }
   0x8   :  { %p2640_p3 = scmp.ne.s32.totalorder %s29_s25, %s2639_s10  ;;  %p2645_p5 = scmp.lt.s32.totalorder %s2639_s10, %s2639_s10 }
   0xa   :  { %p2646_p6 = por %p2645_p5, %p2644_p4 }
   0xc   :  { %p2647_p7 = pnand %p2646_p6, %p2640_p3 }
   0xe   :  { %2650 = shalt.err (!%p2647_p7)
}
   0xf   :  { %s2654_s11 = smov 128   ;;  %s2655_s12 = smov 8  }
  0x10   :  { %34 = dma.hbm_to_vmem [thread:$0]  %s4873_s5, 896, %s29_s25, [#allocation3], %s2654_s11, %s2654_s11, %s2655_s12  }
  0x11   :  { %2651 = dma.done.wait [#allocation3], 896  }
  0x12   :  { %2652 = vsyncadd [#allocation3], 4294966400  ;;  %v4876_v0 = vmov 0.0   ;;  %s2657_s15 = smov 1   ;;  %v42_v1 = vld [vmem:[%s4868_s0 + $0x4] sm:$0x3] }
  0x13   :  { %136 = vrot.lane.b32.xlu0 %v4876_v0, %s2657_s15  ;;  %v40_v2 = vld [vmem:[%s4868_s0] sm:$0x3]  ;;  %140 = vrot.lane.b32.xlu1 %v42_v1, %s2657_s15  ;;  %v44_v3 = vld [vmem:[%s4868_s0 + $0x8] sm:$0x3]  ;;  %s2658_s29 = smov 2   ;;  %s2659_s22 = smov 3  }
  0x14   :  { %v46_v4 = vld [vmem:[%s4868_s0 + $0xc] sm:$0x3]  ;;  %v48_v5 = vld [vmem:[%s4868_s0 + $0x10] sm:$0x3]  ;;  %v2749_v6 = vld [vmem:[%s4868_s0 + $0x14] sm:$0x3] }
  0x15   :  { %v2757_v7 = vld [vmem:[%s4868_s0 + $0x18] sm:$0x3]  ;;  %v2766_v8 = vld [vmem:[%s4868_s0 + $0x2] sm:$0x3]  ;;  %v2771_v9 = vld [vmem:[%s4868_s0 + $0x6] sm:$0x3] }
  0x16   :  { %v2780_v10 = vld [vmem:[%s4868_s0 + $0xa] sm:$0x3]  ;;  %v2785_v11 = vld [vmem:[%s4868_s0 + $0xe] sm:$0x3]  ;;  %v2794_v12 = vld [vmem:[%s4868_s0 + $0x12] sm:$0x3] }
  0x17   :  { %138 = vrot.lane.b32.xlu0 %v40_v2, %s2657_s15  ;;  %142 = vrot.lane.b32.xlu1 %v44_v3, %s2657_s15  ;;  %v2799_v13 = vld [vmem:[%s4868_s0 + $0x16] sm:$0x3]  ;;  %v2808_v14 = vld [vmem:[%s4868_s0 + $0x1a] sm:$0x3]  ;;  %s2660_s25 = smov 4   ;;  %s2661_s13 = smov 5  }
  0x18   :  { %4907 = vst [vmem:[#allocation5_spill] sm:$0xff] %v2808_v14  ;;  %v54_v15 = vld [vmem:[%s4868_s0 + $0x1c] sm:$0x3]  ;;  %v56_v16 = vld [vmem:[%s4868_s0 + $0x20] sm:$0x3]  ;;  %s2662_s8 = smov 6  }
  0x19   :  { %v2840_v17 = vld [vmem:[%s4868_s0 + $0x24] sm:$0x3]  ;;  %v2848_v18 = vld [vmem:[%s4868_s0 + $0x28] sm:$0x3]  ;;  %v2861_v19 = vld [vmem:[%s4868_s0 + $0x1e] sm:$0x3] }
  0x1a   :  { %4908 = vst [vmem:[#allocation6_spill] sm:$0xff] %v2861_v19  ;;  %v2871_v20 = vld [vmem:[%s4868_s0 + $0x2c] sm:$0x3]  ;;  %v2879_v21 = vld [vmem:[%s4868_s0 + $0x30] sm:$0x3]  ;;  %vm1136_vm0 = vcmask 1046528  }
  0x1b   :  { %144 = vrot.lane.b32.xlu0 %v46_v4, %s2657_s15  ;;  %146 = vrot.lane.b32.xlu1 %v48_v5, %s2657_s15  ;;  %v2884_v22 = vld [vmem:[%s4868_s0 + $0x34] sm:$0x3]  ;;  %v2893_v23 = vld [vmem:[%s4868_s0 + $0x38] sm:$0x3]  ;;  %vm745_vm1 = vcmask 7168   ;;  %vm778_vm2 = vcmask 15360  }
  0x1c   :  { %v2902_v24 = vld [vmem:[%s4868_s0 + $0x22] sm:$0x3]  ;;  %v2907_v25 = vld [vmem:[%s4868_s0 + $0x26] sm:$0x3]  ;;  %v2916_v26 = vld [vmem:[%s4868_s0 + $0x2a] sm:$0x3] }
  0x1d   :  { %4909 = vst [vmem:[#allocation7_spill] sm:$0xff] %v2902_v24  ;;  %4910 = vst [vmem:[#allocation8_spill] sm:$0xff] %v2907_v25  ;;  %v2935_v27 = vld [vmem:[%s4868_s0 + $0x2e] sm:$0x3]  ;;  %v2946_v29 = vld [vmem:[%s4868_s0 + $0x32] sm:$0x3] }
  0x1e   :  { %4911 = vst [vmem:[#allocation9_spill] sm:$0xff] %v2916_v26  ;;  %4912 = vst [vmem:[#allocation10_spill] sm:$0xff] %v2935_v27  ;;  %v2951_v30 = vld [vmem:[%s4868_s0 + $0x36] sm:$0x3]  ;;  %v2960_v31 = vld [vmem:[%s4868_s0 + $0x3a] sm:$0x3] }
  0x1f   :  { %148 = vrot.lane.b32.xlu0 %v2749_v6, %s2657_s15  ;;  %150 = vrot.lane.b32.xlu1 %v2757_v7, %s2657_s15  ;;  %4913 = vst [vmem:[#allocation11_spill] sm:$0xff] %v2946_v29  ;;  %4914 = vst [vmem:[#allocation12_spill] sm:$0xff] %v2960_v31  ;;  %v943_v38 = vld [vmem:[%s4869_s1] sm:$0x7f]  ;;  %v3015_v45 = vld [vmem:[%s4868_s0 + $0x3c] sm:$0x3] }
  0x20   :  { %2505 = vmatprep.subr.msk.mxu0 %vm1136_vm0, %v943_v38  ;;  %v3044_v52 = vld [vmem:[%s4868_s0 + $0x40] sm:$0x3]  ;;  %v3049_v53 = vld [vmem:[%s4868_s0 + $0x44] sm:$0x3]  ;;  %v3062_v56 = vld [vmem:[%s4868_s0 + $0x48] sm:$0x3] }
  0x21   :  { %2506 = vmatpush3.msk.msra.mxu0 %vm1136_vm0, %v943_v38  ;;  %4915 = vst [vmem:[#allocation13_spill] sm:$0xff] %v3049_v53  ;;  %4916 = vst [vmem:[#allocation14_spill] sm:$0xff] %v3062_v56  ;;  %v3083_v61 = vld [vmem:[%s4868_s0 + $0x3e] sm:$0x3]  ;;  %v3153_v38 = vld [vmem:[%s4868_s0 + $0x46] sm:$0x3] }
  0x22   :  { %4923 = vst [vmem:[#allocation21_spill] sm:$0xff] %v3153_v38  ;;  %vm811_vm3 = vcmask 23552   ;;  %vm844_vm4 = vcmask 31744   ;;  %vm877_vm5 = vcmask 39936   ;;  %vm910_vm6 = vcmask 48128   ;;  %s2667_s14 = smov 64  }
  0x23   :  { %263 = vrot.lane.b32.xlu0 %v4876_v0, %s2658_s29  ;;  %265 = vrot.lane.b32.xlu1 %v2766_v8, %s2658_s29  ;;  %vm1119_vm7 = vcmask 56320   ;;  %s2668_s16 = smov 80   ;;  %s2669_s23 = smov 96   ;;  %vm1699_vm8 = vcmask 130048   ;;  %vm1716_vm9 = vcmask 261120   ;;  %vm1733_vm10 = vcmask 392192  }
  0x24   :  { %vm1750_vm11 = vcmask 523264   ;;  %vm1767_vm12 = vcmask 654336   ;;  %vm1784_vm13 = vcmask 785408   ;;  %vm1906_vm14 = vcmask 916480  }
  0x25   :  { %vm2223_vm15 = vcmask 64512   ;;  %vm2240_vm0 = vcmask 195584  }
  0x27   :  { %267 = vrot.lane.b32.xlu0 %v2771_v9, %s2658_s29  ;;  %269 = vrot.lane.b32.xlu1 %v2780_v10, %s2658_s29 }
  0x2b   :  { %271 = vrot.lane.b32.xlu0 %v2785_v11, %s2658_s29  ;;  %273 = vrot.lane.b32.xlu1 %v2794_v12, %s2658_s29 }
  0x2f   :  { %275 = vrot.lane.b32.xlu0 %v2799_v13, %s2658_s29  ;;  %277 = vrot.lane.b32.xlu1 %v2808_v14, %s2658_s29 }
  0x33   :  { %360 = vrot.lane.b32.xlu0 %v40_v2, %s2659_s22  ;;  %362 = vrot.lane.b32.xlu1 %v42_v1, %s2659_s22 }
  0x37   :  { %364 = vrot.lane.b32.xlu0 %v44_v3, %s2659_s22  ;;  %366 = vrot.lane.b32.xlu1 %v46_v4, %s2659_s22 }
  0x3b   :  { %368 = vrot.lane.b32.xlu0 %v48_v5, %s2659_s22  ;;  %370 = vrot.lane.b32.xlu1 %v2749_v6, %s2659_s22 }
  0x3f   :  { %372 = vrot.lane.b32.xlu0 %v2757_v7, %s2659_s22  ;;  %374 = vrot.lane.b32.xlu1 %v54_v15, %s2659_s22 }
  0x43   :  { %457 = vrot.lane.b32.xlu0 %v2766_v8, %s2660_s25  ;;  %459 = vrot.lane.b32.xlu1 %v2771_v9, %s2660_s25 }
  0x47   :  { %461 = vrot.lane.b32.xlu0 %v2780_v10, %s2660_s25  ;;  %463 = vrot.lane.b32.xlu1 %v2785_v11, %s2660_s25 }
  0x4b   :  { %152 = vrot.lane.b32.xlu0 %v54_v15, %s2657_s15  ;;  %154 = vrot.lane.b32.xlu1 %v56_v16, %s2657_s15 }
  0x4f   :  { %156 = vrot.lane.b32.xlu0 %v2840_v17, %s2657_s15  ;;  %158 = vrot.lane.b32.xlu1 %v2848_v18, %s2657_s15 }
  0x53   :  { %465 = vrot.lane.b32.xlu0 %v2794_v12, %s2660_s25  ;;  %467 = vrot.lane.b32.xlu1 %v2799_v13, %s2660_s25 }
  0x57   :  { %469 = vrot.lane.b32.xlu0 %v2808_v14, %s2660_s25  ;;  %471 = vrot.lane.b32.xlu1 %v2861_v19, %s2660_s25 }
  0x5b   :  { %553 = vrot.lane.b32.xlu0 %v42_v1, %s2661_s13  ;;  %555 = vrot.lane.b32.xlu1 %v44_v3, %s2661_s13  ;;  %v3104_v3 = vld [vmem:[%s4868_s0 + $0x4c] sm:$0x3] }
  0x5f   :  { %557 = vrot.lane.b32.xlu0 %v46_v4, %s2661_s13  ;;  %559 = vrot.lane.b32.xlu1 %v48_v5, %s2661_s13 }
  0x63   :  { %160 = vrot.lane.b32.xlu0 %v2871_v20, %s2657_s15  ;;  %162 = vrot.lane.b32.xlu1 %v2879_v21, %s2657_s15 }
  0x67   :  { %164 = vrot.lane.b32.xlu0 %v2884_v22, %s2657_s15  ;;  %166 = vrot.lane.b32.xlu1 %v2893_v23, %s2657_s15 }
  0x6b   :  { %279 = vrot.lane.b32.xlu0 %v2861_v19, %s2658_s29  ;;  %281 = vrot.lane.b32.xlu1 %v2902_v24, %s2658_s29 }
  0x6f   :  { %283 = vrot.lane.b32.xlu0 %v2907_v25, %s2658_s29  ;;  %285 = vrot.lane.b32.xlu1 %v2916_v26, %s2658_s29 }
  0x73   :  { %561 = vrot.lane.b32.xlu0 %v2749_v6, %s2661_s13  ;;  %563 = vrot.lane.b32.xlu1 %v2757_v7, %s2661_s13  ;;  %v3117_v6 = vld [vmem:[%s4868_s0 + $0x50] sm:$0x3]  ;;  %v3122_v7 = vld [vmem:[%s4868_s0 + $0x54] sm:$0x3] }
  0x77   :  { %565 = vrot.lane.b32.xlu0 %v54_v15, %s2661_s13  ;;  %567 = vrot.lane.b32.xlu1 %v56_v16, %s2661_s13 }
  0x7b   :  { %649 = vrot.lane.b32.xlu0 %v2771_v9, %s2662_s8  ;;  %651 = vrot.lane.b32.xlu1 %v2780_v10, %s2662_s8 }
  0x7f   :  { %653 = vrot.lane.b32.xlu0 %v2785_v11, %s2662_s8  ;;  %655 = vrot.lane.b32.xlu1 %v2794_v12, %s2662_s8 }
  0x83   :  { %287 = vrot.lane.b32.xlu0 %v2935_v27, %s2658_s29  ;;  %289 = vrot.lane.b32.xlu1 %v2946_v29, %s2658_s29 }
  0x85   :  { %v2941_v28 = vpop.permute.xlu0 %136  ;;  %v2962_v32 = vpop.permute.xlu1 %140 }
  0x87   :  { %291 = vrot.lane.b32.xlu0 %v2951_v30, %s2658_s29  ;;  %293 = vrot.lane.b32.xlu1 %v2960_v31, %s2658_s29 }
  0x89   :  { %v2964_v33 = vpop.permute.xlu0 %138  ;;  %v2969_v34 = vpop.permute.xlu1 %142 }
  0x8b   :  { %376 = vrot.lane.b32.xlu0 %v56_v16, %s2659_s22  ;;  %378 = vrot.lane.b32.xlu1 %v2840_v17, %s2659_s22 }
  0x8d   :  { %v2971_v35 = vpop.permute.xlu0 %144  ;;  %v2977_v36 = vpop.permute.xlu1 %146 }
  0x8f   :  { %380 = vrot.lane.b32.xlu0 %v2848_v18, %s2659_s22  ;;  %382 = vrot.lane.b32.xlu1 %v2871_v20, %s2659_s22 }
  0x91   :  { %v2979_v37 = vpop.permute.xlu0 %148  ;;  %v2988_v39 = vpop.permute.xlu1 %150 }
  0x93   :  { %657 = vrot.lane.b32.xlu0 %v2799_v13, %s2662_s8  ;;  %659 = vrot.lane.b32.xlu1 %v2808_v14, %s2662_s8 }
  0x95   :  { %v2990_v40 = vpop.permute.xlu0 %263  ;;  %v2996_v41 = vpop.permute.xlu1 %265 }
  0x97   :  { %661 = vrot.lane.b32.xlu0 %v2861_v19, %s2662_s8  ;;  %663 = vrot.lane.b32.xlu1 %v2902_v24, %s2662_s8 }
  0x99   :  { %v2998_v42 = vpop.permute.xlu0 %267  ;;  %v3004_v43 = vpop.permute.xlu1 %269 }
  0x9b   :  { %384 = vrot.lane.b32.xlu0 %v2879_v21, %s2659_s22  ;;  %386 = vrot.lane.b32.xlu1 %v2884_v22, %s2659_s22 }
  0x9d   :  { %v3006_v44 = vpop.permute.xlu0 %271  ;;  %v3017_v46 = vpop.permute.xlu1 %273 }
  0x9f   :  { %388 = vrot.lane.b32.xlu0 %v2893_v23, %s2659_s22  ;;  %390 = vrot.lane.b32.xlu1 %v3015_v45, %s2659_s22 }
  0xa1   :  { %v3019_v47 = vpop.permute.xlu0 %275  ;;  %v3025_v48 = vpop.permute.xlu1 %277 }
  0xa3   :  { %473 = vrot.lane.b32.xlu0 %v2902_v24, %s2660_s25  ;;  %475 = vrot.lane.b32.xlu1 %v2907_v25, %s2660_s25  ;;  %v3166_v24 = vld [vmem:[%s4868_s0 + $0x4a] sm:$0x3] }
  0xa4   :  { %4925 = vst [vmem:[#allocation23_spill] sm:$0xff] %v3166_v24 }
  0xa5   :  { %v3027_v49 = vpop.permute.xlu0 %360  ;;  %v3033_v50 = vpop.permute.xlu1 %362 }
  0xa7   :  { %477 = vrot.lane.b32.xlu0 %v2916_v26, %s2660_s25  ;;  %479 = vrot.lane.b32.xlu1 %v2935_v27, %s2660_s25 }
  0xa9   :  { %v3035_v51 = vpop.permute.xlu0 %364  ;;  %v3051_v54 = vpop.permute.xlu1 %366 }
  0xab   :  { %168 = vrot.lane.b32.xlu0 %v3015_v45, %s2657_s15  ;;  %170 = vrot.lane.b32.xlu1 %v3044_v52, %s2657_s15 }
  0xad   :  { %v3053_v55 = vpop.permute.xlu0 %368  ;;  %v3064_v57 = vpop.permute.xlu1 %370 }
  0xaf   :  { %172 = vrot.lane.b32.xlu0 %v3049_v53, %s2657_s15  ;;  %174 = vrot.lane.b32.xlu1 %v3062_v56, %s2657_s15 }
  0xb1   :  { %v3066_v58 = vpop.permute.xlu0 %372  ;;  %v3072_v59 = vpop.permute.xlu1 %374 }
  0xb3   :  { %481 = vrot.lane.b32.xlu0 %v2946_v29, %s2660_s25  ;;  %483 = vrot.lane.b32.xlu1 %v2951_v30, %s2660_s25 }
  0xb5   :  { %v3074_v60 = vpop.permute.xlu0 %457  ;;  %v3085_v62 = vpop.permute.xlu1 %459 }
  0xb7   :  { %485 = vrot.lane.b32.xlu0 %v2960_v31, %s2660_s25  ;;  %487 = vrot.lane.b32.xlu1 %v3083_v61, %s2660_s25 }
  0xb9   :  { %v3087_v63 = vpop.permute.xlu0 %461  ;;  %v3093_v1 = vpop.permute.xlu1 %463 }
  0xbb   :  { %569 = vrot.lane.b32.xlu0 %v2840_v17, %s2661_s13  ;;  %571 = vrot.lane.b32.xlu1 %v2848_v18, %s2661_s13  ;;  %v3135_v17 = vld [vmem:[%s4868_s0 + $0x58] sm:$0x3] }
  0xbd   :  { %v3095_v2 = vpop.permute.xlu0 %152  ;;  %v3106_v4 = vpop.permute.xlu1 %154 }
  0xbe   :  { %4917 = vst [vmem:[#allocation15_spill] sm:$0xff] %v3095_v2  ;;  %4918 = vst [vmem:[#allocation16_spill] sm:$0xff] %v3106_v4 }
  0xbf   :  { %573 = vrot.lane.b32.xlu0 %v2871_v20, %s2661_s13  ;;  %575 = vrot.lane.b32.xlu1 %v2879_v21, %s2661_s13  ;;  %v3148_v21 = vld [vmem:[%s4868_s0 + $0x42] sm:$0x3] }
  0xc0   :  { %4922 = vst [vmem:[#allocation20_spill] sm:$0xff] %v3148_v21 }
  0xc1   :  { %v3108_v5 = vpop.permute.xlu0 %156  ;;  %v3124_v15 = vpop.permute.xlu1 %158 }
  0xc2   :  { %4919 = vst [vmem:[#allocation17_spill] sm:$0xff] %v3108_v5  ;;  %4920 = vst [vmem:[#allocation18_spill] sm:$0xff] %v3124_v15 }
  0xc3   :  { %176 = vrot.lane.b32.xlu0 %v3104_v3, %s2657_s15  ;;  %178 = vrot.lane.b32.xlu1 %v3117_v6, %s2657_s15 }
  0xc5   :  { %v3126_v16 = vpop.permute.xlu0 %465  ;;  %v3137_v18 = vpop.permute.xlu1 %467 }
  0xc7   :  { %180 = vrot.lane.b32.xlu0 %v3122_v7, %s2657_s15  ;;  %182 = vrot.lane.b32.xlu1 %v3135_v17, %s2657_s15 }
  0xc9   :  { %v3139_v20 = vpop.permute.xlu0 %469  ;;  %v3155_v0 = vpop.permute.xlu1 %471 }
  0xca   :  { %4921 = vst [vmem:[#allocation19_spill] sm:$0xff] %v3139_v20  ;;  %4924 = vst [vmem:[#allocation22_spill] sm:$0xff] %v3155_v0 }
  0xcb   :  { %295 = vrot.lane.b32.xlu0 %v3083_v61, %s2658_s29  ;;  %297 = vrot.lane.b32.xlu1 %v3148_v21, %s2658_s29 }
  0xcd   :  { %v3157_v15 = vpop.permute.xlu0 %553  ;;  %v556_v5 = vpop.permute.xlu1 %555 }
  0xcf   :  { %299 = vrot.lane.b32.xlu0 %v3153_v38, %s2658_s29  ;;  %301 = vrot.lane.b32.xlu1 %v3166_v24, %s2658_s29 }
  0xd1   :  { %v3168_v14 = vpop.permute.xlu0 %557  ;;  %v3174_v2 = vpop.permute.xlu1 %559 }
  0xd3   :  { %577 = vrot.lane.b32.xlu0 %v2884_v22, %s2661_s13  ;;  %579 = vrot.lane.b32.xlu1 %v2893_v23, %s2661_s13  ;;  %v3201_v23 = vld [vmem:[%s4868_s0 + $0x4e] sm:$0x3] }
  0xd4   :  { %4931 = vst [vmem:[#allocation29_spill] sm:$0xff] %v3201_v23 }
  0xd5   :  { %v3176_v19 = vpop.permute.xlu0 %160  ;;  %v3182_v4 = vpop.permute.xlu1 %162 }
  0xd6   :  { %4926 = vst [vmem:[#allocation24_spill] sm:$0xff] %v3176_v19  ;;  %4927 = vst [vmem:[#allocation25_spill] sm:$0xff] %v3182_v4 }
  0xd7   :  { %581 = vrot.lane.b32.xlu0 %v3015_v45, %s2661_s13  ;;  %583 = vrot.lane.b32.xlu1 %v3044_v52, %s2661_s13 }
  0xd9   :  { %v3184_v0 = vpop.permute.xlu0 %164  ;;  %v3190_v22 = vpop.permute.xlu1 %166 }
  0xda   :  { %4928 = vst [vmem:[#allocation26_spill] sm:$0xff] %v3184_v0  ;;  %4929 = vst [vmem:[#allocation27_spill] sm:$0xff] %v3190_v22  ;;  %v3214_v22 = vld [vmem:[%s4868_s0 + $0x52] sm:$0x3] }
  0xdb   :  { %665 = vrot.lane.b32.xlu0 %v2907_v25, %s2662_s8  ;;  %667 = vrot.lane.b32.xlu1 %v2916_v26, %s2662_s8  ;;  %4934 = vst [vmem:[#allocation32_spill] sm:$0xff] %v3214_v22  ;;  %v3219_v26 = vld [vmem:[%s4868_s0 + $0x56] sm:$0x3] }
  0xdc   :  { %4935 = vst [vmem:[#allocation33_spill] sm:$0xff] %v3219_v26 }
  0xdd   :  { %v3192_v20 = vpop.permute.xlu0 %279  ;;  %v3203_v45 = vpop.permute.xlu1 %281 }
  0xde   :  { %4930 = vst [vmem:[#allocation28_spill] sm:$0xff] %v3192_v20  ;;  %4932 = vst [vmem:[#allocation30_spill] sm:$0xff] %v3203_v45  ;;  %v988_v20 = vlaneseq  ;;  %v747_v45 = vsel %vm745_vm1, 0.0, %v2964_v33 }
  0xdf   :  { %669 = vrot.lane.b32.xlu0 %v2935_v27, %s2662_s8  ;;  %671 = vrot.lane.b32.xlu1 %v2946_v29, %s2662_s8  ;;  %v3232_v29 = vld [vmem:[%s4868_s0 + $0x5a] sm:$0x3] }
  0xe0   :  { %4937 = vst [vmem:[#allocation35_spill] sm:$0xff] %v3232_v29 }
  0xe1   :  { %v3205_v0 = vpop.permute.xlu0 %283  ;;  %v3221_v19 = vpop.permute.xlu1 %285 }
  0xe2   :  { %4933 = vst [vmem:[#allocation31_spill] sm:$0xff] %v3205_v0  ;;  %4936 = vst [vmem:[#allocation34_spill] sm:$0xff] %v3221_v19  ;;  %v2663_v19 = vmov 1983009808  }
  0xe3   :  { %303 = vrot.lane.b32.xlu0 %v3201_v23, %s2658_s29  ;;  %305 = vrot.lane.b32.xlu1 %v3214_v22, %s2658_s29  ;;  %v986_v25 = vunpack.c.l.s4 %v2663_v19 }
  0xe5   :  { %v3223_v27 = vpop.permute.xlu0 %561  ;;  %v3234_v4 = vpop.permute.xlu1 %563 }
  0xe7   :  { %307 = vrot.lane.b32.xlu0 %v3219_v26, %s2658_s29  ;;  %309 = vrot.lane.b32.xlu1 %v3232_v29, %s2658_s29  ;;  %v746_v29 = vsel %vm745_vm1, 0.0, %v2941_v28  ;;  %v749_v28 = vsel %vm745_vm1, %v2771_v9, %v2969_v34 }
  0xe8   :  { %v779_v19 = vsel %vm778_vm2, %v746_v29, %v2990_v40 }
  0xe9   :  { %v3236_v0 = vpop.permute.xlu0 %565  ;;  %v3244_v26 = vpop.permute.xlu1 %567 }
  0xea   :  { %4938 = vst [vmem:[#allocation36_spill] sm:$0xff] %v3236_v0  ;;  %v780_v0 = vsel %vm778_vm2, %v747_v45, %v2996_v41  ;;  %v987_v41 = vunpack.c.0.s8 %v986_v25  ;;  %v989_v45 = vshrl.u32 %v988_v20, 7  ;;  %v782_v25 = vsel %vm778_vm2, %v749_v28, %v3004_v43 }
  0xeb   :  { %392 = vrot.lane.b32.xlu0 %v3044_v52, %s2659_s22  ;;  %v813_v52 = vsel %vm811_vm3, %v780_v0, %v3033_v50  ;;  %394 = vrot.lane.b32.xlu1 %v3049_v53, %s2659_s22  ;;  %v748_v0 = vsel %vm745_vm1, %v2766_v8, %v2962_v32  ;;  %v812_v50 = vsel %vm811_vm3, %v779_v19, %v3027_v49 }
  0xec   :  { %v846_v33 = vsel %vm844_vm4, %v813_v52, %v3085_v62  ;;  %v781_v40 = vsel %vm778_vm2, %v748_v0, %v2998_v42  ;;  %v845_v8 = vsel %vm844_vm4, %v812_v50, %v3074_v60  ;;  %v815_v34 = vsel %vm811_vm3, %v782_v25, %v3051_v54 }
  0xed   :  { %v650_v22 = vpop.permute.xlu0 %649  ;;  %v652_v53 = vpop.permute.xlu1 %651  ;;  %v814_v9 = vsel %vm811_vm3, %v781_v40, %v3035_v51  ;;  %v878_v49 = vsel %vm877_vm5, %v845_v8, %v3157_v15  ;;  %v848_v43 = vsel %vm844_vm4, %v815_v34, %v3093_v1  ;;  %v751_v28 = vsel %vm745_vm1, %v2785_v11, %v2977_v36 }
  0xee   :  { %v847_v42 = vsel %vm844_vm4, %v814_v9, %v3087_v63  ;;  %v911_v51 = vsel %vm910_vm6, %v878_v49, %v650_v22  ;;  %v881_v54 = vsel %vm877_vm5, %v848_v43, %v3174_v2  ;;  %v784_v40 = vsel %vm778_vm2, %v751_v28, %v3017_v46 }
  0xef   :  { %396 = vrot.lane.b32.xlu0 %v3062_v56, %s2659_s22  ;;  %v879_v56 = vsel %vm877_vm5, %v846_v33, %v556_v5  ;;  %398 = vrot.lane.b32.xlu1 %v3104_v3, %s2659_s22  ;;  %v3297_v5 = vsub.s32 %v987_v41, %v989_v45  ;;  %v3327_v41 = vld [vmem:[%s4868_s0 + $0x5c] sm:$0x3]  ;;  %v750_v25 = vsel %vm745_vm1, %v2780_v10, %v2971_v35 }
  0xf0   :  { %v912_v32 = vsel %vm910_vm6, %v879_v56, %v652_v53  ;;  %v880_v53 = vsel %vm877_vm5, %v847_v42, %v3168_v14  ;;  %v817_v8 = vsel %vm811_vm3, %v784_v40, %v3064_v57  ;;  %v783_v11 = vsel %vm778_vm2, %v750_v25, %v3006_v44  ;;  %v4943_v40 = vld [vmem:[#allocation33_spill] sm:$0xff]  ;;  %v4944_v25 = vld [vmem:[#allocation35_spill] sm:$0xff] }
  0xf1   :  { %v654_v29 = vpop.permute.xlu0 %653  ;;  %v983_v56 = vcombine.low %v911_v51, %v912_v32  ;;  %v656_v60 = vpop.permute.xlu1 %655  ;;  %v850_v36 = vsel %vm844_vm4, %v817_v8, %v3137_v18  ;;  %v752_v46 = vsel %vm745_vm1, %v2794_v12, %v2979_v37  ;;  %v753_v10 = vsel %vm745_vm1, %v2799_v13, %v2988_v39  ;;  %v4941_v34 = vld [vmem:[#allocation36_spill] sm:$0xff]  ;;  %v3438_v8 = vld [vmem:[%s4868_s0 + $0x5e] sm:$0x3] }
  0xf2   :  { %v913_v15 = vsel %vm910_vm6, %v880_v53, %v654_v29  ;;  %v914_v63 = vsel %vm910_vm6, %v881_v54, %v656_v60  ;;  %v816_v35 = vsel %vm811_vm3, %v783_v11, %v3053_v55  ;;  %v883_v57 = vsel %vm877_vm5, %v850_v36, %v3234_v4  ;;  %v4940_v4 = vld [vmem:[#allocation22_spill] sm:$0xff] }
  0xf3   :  { %673 = vrot.lane.b32.xlu0 %v2951_v30, %s2662_s8  ;;  %v984_v20 = vcombine.low %v913_v15, %v914_v63  ;;  %675 = vrot.lane.b32.xlu1 %v2960_v31, %s2662_s8  ;;  %v991_v2 = vrot.slane %v983_v56, %v3297_v5  ;;  %v785_v44 = vsel %vm778_vm2, %v752_v46, %v3019_v47  ;;  %v4939_v47 = vld [vmem:[#allocation19_spill] sm:$0xff]  ;;  %v4945_v46 = vld [vmem:[#allocation13_spill] sm:$0xff] }
  0xf4   :  { %v786_v18 = vsel %vm778_vm2, %v753_v10, %v3025_v48  ;;  %v849_v12 = vsel %vm844_vm4, %v816_v35, %v3126_v16  ;;  %v818_v13 = vsel %vm811_vm3, %v785_v44, %v3066_v58  ;;  %v3414_v15 = vld [vmem:[%s4868_s0 + $0x68] sm:$0x3] }
  0xf5   :  { %v3295_v62 = vpop.permute.xlu0 %287  ;;  %v3305_v14 = vpop.permute.xlu1 %289  ;;  %v998_v22 = vrot.slane %v984_v20, %v3297_v5  ;;  %v819_v39 = vsel %vm811_vm3, %v786_v18, %v3072_v59  ;;  %v882_v55 = vsel %vm877_vm5, %v849_v12, %v3223_v27  ;;  %v851_v48 = vsel %vm844_vm4, %v818_v13, %v4939_v47  ;;  %v3392_v59 = vld [vmem:[%s4868_s0 + $0x60] sm:$0x3]  ;;  %v3397_v27 = vld [vmem:[%s4868_s0 + $0x64] sm:$0x3]  ;;  %v3472_v18 = vld [vmem:[%s4868_s0 + $0x70] sm:$0x3] }
  0xf6   :  { %v852_v16 = vsel %vm844_vm4, %v819_v39, %v4940_v4  ;;  %v884_v49 = vsel %vm877_vm5, %v851_v48, %v4941_v34  ;;  %v3508_v47 = vld [vmem:[%s4868_s0 + $0x66] sm:$0x3] }
  0xf7   :  { %677 = vrot.lane.b32.xlu0 %v3083_v61, %s2662_s8  ;;  %679 = vrot.lane.b32.xlu1 %v3148_v21, %s2662_s8  ;;  %v999_v52 = vcombine.low %v991_v2, %v998_v22  ;;  %v885_v42 = vsel %vm877_vm5, %v852_v16, %v3244_v26  ;;  %v3519_v16 = vld [vmem:[%s4868_s0 + $0x6a] sm:$0x3] }
  0xf9   :  { %v3307_v1 = vpop.permute.xlu0 %291  ;;  %v3315_v19 = vpop.permute.xlu1 %293  ;;  %2507 = vmatprep.mubr.msk.f32.mxu0 %vm1119_vm7, %v999_v52  ;;  %v4942_v52 = vld [vmem:[#allocation32_spill] sm:$0xff] }
  0xfb   :  { %400 = vrot.lane.b32.xlu0 %v3117_v6, %s2659_s22  ;;  %402 = vrot.lane.b32.xlu1 %v3122_v7, %s2659_s22 }
  0xfd   :  { %v3318_v33 = vpop.permute.xlu0 %376  ;;  %v3329_v45 = vpop.permute.xlu1 %378 }
  0xff   :  { %404 = vrot.lane.b32.xlu0 %v3135_v17, %s2659_s22  ;;  %406 = vrot.lane.b32.xlu1 %v3327_v41, %s2659_s22 }
 0x101   :  { %v3331_v0 = vpop.permute.xlu0 %380  ;;  %v3340_v50 = vpop.permute.xlu1 %382 }
 0x103   :  { %489 = vrot.lane.b32.xlu0 %v3148_v21, %s2660_s25  ;;  %491 = vrot.lane.b32.xlu1 %v3153_v38, %s2660_s25 }
 0x105   :  { %v658_v29 = vpop.permute.xlu0 %657  ;;  %v660_v32 = vpop.permute.xlu1 %659 }
 0x106   :  { %v916_v37 = vsel %vm910_vm6, %v883_v57, %v660_v32  ;;  %v915_v58 = vsel %vm910_vm6, %v882_v55, %v658_v29  ;;  %v4947_v57 = vld [vmem:[#allocation14_spill] sm:$0xff]  ;;  %v3459_v32 = vld [vmem:[%s4868_s0 + $0x6c] sm:$0x3] }
 0x107   :  { %493 = vrot.lane.b32.xlu0 %v3166_v24, %s2660_s25  ;;  %495 = vrot.lane.b32.xlu1 %v3201_v23, %s2660_s25  ;;  %v1000_v43 = vcombine.low %v915_v58, %v916_v37  ;;  %v3503_v55 = vld [vmem:[%s4868_s0 + $0x62] sm:$0x3] }
 0x109   :  { %v662_v9 = vpop.permute.xlu0 %661  ;;  %v664_v51 = vpop.permute.xlu1 %663  ;;  %v1008_v26 = vrot.slane %v1000_v43, %v3297_v5 }
 0x10a   :  { %v917_v54 = vsel %vm910_vm6, %v884_v49, %v662_v9  ;;  %v918_v56 = vsel %vm910_vm6, %v885_v42, %v664_v51 }
 0x10b   :  { %184 = vrot.lane.b32.xlu0 %v3327_v41, %s2657_s15  ;;  %v1001_v60 = vcombine.low %v917_v54, %v918_v56  ;;  %186 = vrot.lane.b32.xlu1 %v3392_v59, %s2657_s15 }
 0x10d   :  { %v3403_v53 = vpop.permute.xlu0 %384  ;;  %v1015_v63 = vrot.slane %v1001_v60, %v3297_v5  ;;  %v3418_v20 = vpop.permute.xlu1 %386  ;;  %v3563_v60 = vld [vmem:[%s4868_s0 + $0x72] sm:$0x3] }
 0x10f   :  { %188 = vrot.lane.b32.xlu0 %v3397_v27, %s2657_s15  ;;  %v1016_v22 = vcombine.low %v1008_v26, %v1015_v63  ;;  %190 = vrot.lane.b32.xlu1 %v3414_v15, %s2657_s15  ;;  %v3568_v26 = vld [vmem:[%s4868_s0 + $0x76] sm:$0x3] }
 0x110   :  { %4957 = vst [vmem:[#allocation40_spill] sm:$0xff] %v3568_v26 }
 0x111   :  { %v3420_v2 = vpop.permute.xlu0 %388  ;;  %v3426_v28 = vpop.permute.xlu1 %390  ;;  %2508 = vmatmul.mubr.msk.f32.vlgmr.msra.gmra.mrb[0].mxu0 %vm1119_vm7, %v1016_v22 }
 0x113   :  { %497 = vrot.lane.b32.xlu0 %v4942_v52, %s2660_s25  ;;  %499 = vrot.lane.b32.xlu1 %v4943_v40, %s2660_s25 }
 0x115   :  { %v3429_v29 = vpop.permute.xlu0 %473  ;;  %v3440_v11 = vpop.permute.xlu1 %475 }
 0x117   :  { %501 = vrot.lane.b32.xlu0 %v4944_v25, %s2660_s25  ;;  %503 = vrot.lane.b32.xlu1 %v3438_v8, %s2660_s25 }
 0x119   :  { %v3442_v36 = vpop.permute.xlu0 %477  ;;  %v3448_v10 = vpop.permute.xlu1 %479 }
 0x11b   :  { %585 = vrot.lane.b32.xlu0 %v4945_v46, %s2661_s13  ;;  %587 = vrot.lane.b32.xlu1 %v4947_v57, %s2661_s13  ;;  %v3581_v46 = vld [vmem:[%s4868_s0 + $0x7a] sm:$0x3] }
 0x11d   :  { %v3450_v35 = vpop.permute.xlu0 %168  ;;  %v3461_v9 = vpop.permute.xlu1 %170 }
 0x11e   :  { %4946 = vst [vmem:[#allocation19_spill] sm:$0xff] %v3450_v35 }
 0x11f   :  { %589 = vrot.lane.b32.xlu0 %v3104_v3, %s2661_s13  ;;  %591 = vrot.lane.b32.xlu1 %v3117_v6, %s2661_s13  ;;  %v3477_v3 = vld [vmem:[%s4868_s0 + $0x74] sm:$0x3]  ;;  %v3490_v6 = vld [vmem:[%s4868_s0 + $0x78] sm:$0x3] }
 0x121   :  { %v3463_v44 = vpop.permute.xlu0 %172  ;;  %v3479_v12 = vpop.permute.xlu1 %174 }
 0x122   :  { %4948 = vst [vmem:[#allocation22_spill] sm:$0xff] %v3463_v44  ;;  %4949 = vst [vmem:[#allocation36_spill] sm:$0xff] %v3479_v12 }
 0x123   :  { %192 = vrot.lane.b32.xlu0 %v3459_v32, %s2657_s15  ;;  %194 = vrot.lane.b32.xlu1 %v3472_v18, %s2657_s15 }
 0x125   :  { %v3481_v37 = vpop.permute.xlu0 %481  ;;  %v3492_v13 = vpop.permute.xlu1 %483 }
 0x127   :  { %196 = vrot.lane.b32.xlu0 %v3477_v3, %s2657_s15  ;;  %198 = vrot.lane.b32.xlu1 %v3490_v6, %s2657_s15 }
 0x129   :  { %v3494_v39 = vpop.permute.xlu0 %485  ;;  %v3510_v48 = vpop.permute.xlu1 %487 }
 0x12b   :  { %311 = vrot.lane.b32.xlu0 %v3438_v8, %s2658_s29  ;;  %313 = vrot.lane.b32.xlu1 %v3503_v55, %s2658_s29 }
 0x12d   :  { %v570_v4 = vpop.permute.xlu0 %569  ;;  %v572_v58 = vpop.permute.xlu1 %571 }
 0x12f   :  { %315 = vrot.lane.b32.xlu0 %v3508_v47, %s2658_s29  ;;  %317 = vrot.lane.b32.xlu1 %v3519_v16, %s2658_s29 }
 0x131   :  { %v574_v34 = vpop.permute.xlu0 %573  ;;  %v576_v49 = vpop.permute.xlu1 %575 }
 0x133   :  { %593 = vrot.lane.b32.xlu0 %v3122_v7, %s2661_s13  ;;  %595 = vrot.lane.b32.xlu1 %v3135_v17, %s2661_s13  ;;  %v3550_v17 = vld [vmem:[%s4868_s0 + $0x6e] sm:$0x3] }
 0x135   :  { %v3525_v42 = vpop.permute.xlu0 %176  ;;  %v3531_v43 = vpop.permute.xlu1 %178 }
 0x136   :  { %4950 = vst [vmem:[#allocation33_spill] sm:$0xff] %v3525_v42  ;;  %4951 = vst [vmem:[#allocation35_spill] sm:$0xff] %v3531_v43  ;;  %v4961_v43 = vld [vmem:[#allocation30_spill] sm:$0xff] }
 0x137   :  { %597 = vrot.lane.b32.xlu0 %v3327_v41, %s2661_s13  ;;  %599 = vrot.lane.b32.xlu1 %v3392_v59, %s2661_s13 }
 0x139   :  { %v3533_v51 = vpop.permute.xlu0 %180  ;;  %v3539_v7 = vpop.permute.xlu1 %182 }
 0x13a   :  { %4952 = vst [vmem:[#allocation13_spill] sm:$0xff] %v3533_v51  ;;  %4953 = vst [vmem:[#allocation14_spill] sm:$0xff] %v3539_v7  ;;  %v4960_v51 = vld [vmem:[#allocation6_spill] sm:$0xff] }
 0x13b   :  { %681 = vrot.lane.b32.xlu0 %v3153_v38, %s2662_s8  ;;  %683 = vrot.lane.b32.xlu1 %v3166_v24, %s2662_s8  ;;  %v4963_v38 = vld [vmem:[#allocation5_spill] sm:$0xff] }
 0x13d   :  { %v3541_v54 = vpop.permute.xlu0 %295  ;;  %v3552_v41 = vpop.permute.xlu1 %297 }
 0x13e   :  { %4954 = vst [vmem:[#allocation37_spill] sm:$0xff] %v3541_v54  ;;  %4955 = vst [vmem:[#allocation38_spill] sm:$0xff] %v3552_v41  ;;  %v4969_v41 = vld [vmem:[#allocation31_spill] sm:$0xff] }
 0x13f   :  { %685 = vrot.lane.b32.xlu0 %v3201_v23, %s2662_s8  ;;  %687 = vrot.lane.b32.xlu1 %v4942_v52, %s2662_s8  ;;  %v4959_v52 = vld [vmem:[#allocation16_spill] sm:$0xff] }
 0x140   :  { %v755_v24 = vsel %vm745_vm1, %v4960_v51, %v4959_v52 }
 0x141   :  { %v3554_v56 = vpop.permute.xlu0 %299  ;;  %v3570_v63 = vpop.permute.xlu1 %301 }
 0x142   :  { %4956 = vst [vmem:[#allocation39_spill] sm:$0xff] %v3554_v56  ;;  %4958 = vst [vmem:[#allocation41_spill] sm:$0xff] %v3570_v63  ;;  %v788_v63 = vsel %vm778_vm2, %v755_v24, %v4961_v43  ;;  %v4962_v56 = vld [vmem:[#allocation15_spill] sm:$0xff]  ;;  %v4965_v24 = vld [vmem:[#allocation17_spill] sm:$0xff] }
 0x143   :  { %319 = vrot.lane.b32.xlu0 %v3550_v17, %s2658_s29  ;;  %321 = vrot.lane.b32.xlu1 %v3563_v60, %s2658_s29  ;;  %v754_v12 = vsel %vm745_vm1, %v4963_v38, %v4962_v56  ;;  %v821_v21 = vsel %vm811_vm3, %v788_v63, %v3329_v45  ;;  %v4966_v43 = vld [vmem:[#allocation7_spill] sm:$0xff]  ;;  %v4967_v38 = vld [vmem:[#allocation18_spill] sm:$0xff]  ;;  %v4968_v56 = vld [vmem:[#allocation8_spill] sm:$0xff] }
 0x144   :  { %v854_v51 = vsel %vm844_vm4, %v821_v21, %v3440_v11  ;;  %v756_v44 = vsel %vm745_vm1, %v4966_v43, %v4965_v24  ;;  %v757_v45 = vsel %vm745_vm1, %v4968_v56, %v4967_v38 }
 0x145   :  { %v3572_v22 = vpop.permute.xlu0 %577  ;;  %v3583_v57 = vpop.permute.xlu1 %579  ;;  %v887_v54 = vsel %vm877_vm5, %v854_v51, %v572_v58 }
 0x147   :  { %323 = vrot.lane.b32.xlu0 %v3568_v26, %s2658_s29  ;;  %325 = vrot.lane.b32.xlu1 %v3581_v46, %s2658_s29 }
 0x149   :  { %v3585_v7 = vpop.permute.xlu0 %581  ;;  %v3594_v42 = vpop.permute.xlu1 %583 }
 0x14b   :  { %408 = vrot.lane.b32.xlu0 %v3392_v59, %s2659_s22  ;;  %410 = vrot.lane.b32.xlu1 %v3397_v27, %s2659_s22  ;;  %v4964_v59 = vld [vmem:[#allocation28_spill] sm:$0xff] }
 0x14c   :  { %v787_v52 = vsel %vm778_vm2, %v754_v12, %v4964_v59  ;;  %v789_v12 = vsel %vm778_vm2, %v756_v44, %v4969_v41  ;;  %v4970_v59 = vld [vmem:[#allocation34_spill] sm:$0xff] }
 0x14d   :  { %v666_v23 = vpop.permute.xlu0 %665  ;;  %v820_v63 = vsel %vm811_vm3, %v787_v52, %v3318_v33  ;;  %v668_v31 = vpop.permute.xlu1 %667  ;;  %v790_v21 = vsel %vm778_vm2, %v757_v45, %v4970_v59  ;;  %v822_v43 = vsel %vm811_vm3, %v789_v12, %v3331_v0  ;;  %v102_v45 = vld [vmem:[%s4868_s0 + $0x7c] sm:$0x3] }
 0x14e   :  { %v853_v11 = vsel %vm844_vm4, %v820_v63, %v3429_v29  ;;  %v920_v24 = vsel %vm910_vm6, %v887_v54, %v668_v31  ;;  %v823_v33 = vsel %vm811_vm3, %v790_v21, %v3340_v50  ;;  %v855_v44 = vsel %vm844_vm4, %v822_v43, %v3442_v36  ;;  %v4971_v59 = vld [vmem:[#allocation25_spill] sm:$0xff]  ;;  %v4972_v21 = vld [vmem:[#allocation10_spill] sm:$0xff] }
 0x14f   :  { %412 = vrot.lane.b32.xlu0 %v3414_v15, %s2659_s22  ;;  %v886_v58 = vsel %vm877_vm5, %v853_v11, %v570_v4  ;;  %414 = vrot.lane.b32.xlu1 %v3459_v32, %s2659_s22  ;;  %v856_v31 = vsel %vm844_vm4, %v823_v33, %v3448_v10  ;;  %v888_v0 = vsel %vm877_vm5, %v855_v44, %v574_v34  ;;  %v4974_v44 = vld [vmem:[#allocation9_spill] sm:$0xff] }
 0x150   :  { %v919_v29 = vsel %vm910_vm6, %v886_v58, %v666_v23  ;;  %v889_v50 = vsel %vm877_vm5, %v856_v31, %v576_v49  ;;  %v759_v11 = vsel %vm745_vm1, %v4972_v21, %v4971_v59  ;;  %v4973_v58 = vld [vmem:[#allocation24_spill] sm:$0xff] }
 0x151   :  { %v670_v35 = vpop.permute.xlu0 %669  ;;  %v1017_v54 = vcombine.low %v919_v29, %v920_v24  ;;  %v672_v4 = vpop.permute.xlu1 %671  ;;  %v792_v33 = vsel %vm778_vm2, %v759_v11, %v3305_v14  ;;  %v758_v31 = vsel %vm745_vm1, %v4974_v44, %v4973_v58  ;;  %v4975_v14 = vld [vmem:[#allocation26_spill] sm:$0xff] }
 0x152   :  { %v921_v52 = vsel %vm910_vm6, %v888_v0, %v670_v35  ;;  %v922_v51 = vsel %vm910_vm6, %v889_v50, %v672_v4  ;;  %v825_v29 = vsel %vm811_vm3, %v792_v33, %v3418_v20  ;;  %v791_v0 = vsel %vm778_vm2, %v758_v31, %v3295_v62 }
 0x153   :  { %689 = vrot.lane.b32.xlu0 %v4943_v40, %s2662_s8  ;;  %v1018_v38 = vcombine.low %v921_v52, %v922_v51  ;;  %691 = vrot.lane.b32.xlu1 %v4944_v25, %s2662_s8  ;;  %v1025_v23 = vrot.slane %v1017_v54, %v3297_v5  ;;  %v858_v50 = vsel %vm844_vm4, %v825_v29, %v3492_v13  ;;  %v4976_v54 = vld [vmem:[#allocation11_spill] sm:$0xff] }
 0x154   :  { %v760_v4 = vsel %vm745_vm1, %v4976_v54, %v4975_v14  ;;  %v4977_v52 = vld [vmem:[#allocation27_spill] sm:$0xff]  ;;  %v824_v51 = vsel %vm811_vm3, %v791_v0, %v3403_v53 }
 0x155   :  { %v3643_v41 = vpop.permute.xlu0 %303  ;;  %v1032_v36 = vrot.slane %v1018_v38, %v3297_v5  ;;  %v3653_v10 = vpop.permute.xlu1 %305  ;;  %v761_v20 = vsel %vm745_vm1, %v2951_v30, %v4977_v52  ;;  %v891_v38 = vsel %vm877_vm5, %v858_v50, %v3583_v57  ;;  %v793_v62 = vsel %vm778_vm2, %v760_v4, %v3307_v1 }
 0x156   :  { %v794_v13 = vsel %vm778_vm2, %v761_v20, %v3315_v19  ;;  %v826_v30 = vsel %vm811_vm3, %v793_v62, %v3420_v2 }
 0x157   :  { %693 = vrot.lane.b32.xlu0 %v3438_v8, %s2662_s8  ;;  %v1033_v49 = vcombine.low %v1025_v23, %v1032_v36  ;;  %695 = vrot.lane.b32.xlu1 %v3503_v55, %s2662_s8  ;;  %v827_v53 = vsel %vm811_vm3, %v794_v13, %v3426_v28  ;;  %v859_v1 = vsel %vm844_vm4, %v826_v30, %v3494_v39 }
 0x158   :  { %v860_v19 = vsel %vm844_vm4, %v827_v53, %v3510_v48  ;;  %v892_v28 = vsel %vm877_vm5, %v859_v1, %v3585_v7  ;;  %v103_v48 = vld [vmem:[%s4868_s0 + $0x7e] sm:$0x3]  ;;  %s2664_s0 = smov 16  }
 0x159   :  { %v3655_v34 = vpop.permute.xlu0 %307  ;;  %v3661_v35 = vpop.permute.xlu1 %309  ;;  %2510 = vmatprep.mubr.msk.f32.mxu0 %vm1119_vm7, %v1033_v49  ;;  %v857_v49 = vsel %vm844_vm4, %v824_v51, %v3481_v37  ;;  %v893_v37 = vsel %vm877_vm5, %v860_v19, %v3594_v42 }
 0x15a   :  { %v890_v57 = vsel %vm877_vm5, %v857_v49, %v3572_v22 }
 0x15b   :  { %416 = vrot.lane.b32.xlu0 %v3472_v18, %s2659_s22  ;;  %418 = vrot.lane.b32.xlu1 %v3477_v3, %s2659_s22 }
 0x15d   :  { %v3664_v56 = vpop.permute.xlu0 %392  ;;  %v3673_v63 = vpop.permute.xlu1 %394 }
 0x15f   :  { %420 = vrot.lane.b32.xlu0 %v3490_v6, %s2659_s22  ;;  %422 = vrot.lane.b32.xlu1 %v102_v45, %s2659_s22 }
 0x161   :  { %v3675_v12 = vpop.permute.xlu0 %396  ;;  %v3683_v24 = vpop.permute.xlu1 %398 }
 0x163   :  { %505 = vrot.lane.b32.xlu0 %v3503_v55, %s2660_s25  ;;  %507 = vrot.lane.b32.xlu1 %v3508_v47, %s2660_s25 }
 0x165   :  { %v674_v43 = vpop.permute.xlu0 %673  ;;  %v676_v23 = vpop.permute.xlu1 %675 }
 0x166   :  { %v924_v59 = vsel %vm910_vm6, %v891_v38, %v676_v23  ;;  %v923_v2 = vsel %vm910_vm6, %v890_v57, %v674_v43 }
 0x167   :  { %509 = vrot.lane.b32.xlu0 %v3519_v16, %s2660_s25  ;;  %511 = vrot.lane.b32.xlu1 %v3550_v17, %s2660_s25  ;;  %v1034_v22 = vcombine.low %v923_v2, %v924_v59  ;;  %v763_v2 = vsel %vm745_vm1, %v3083_v61, %v3461_v9  ;;  %v4985_v61 = vld [vmem:[#allocation20_spill] sm:$0xff] }
 0x169   :  { %v678_v36 = vpop.permute.xlu0 %677  ;;  %v680_v21 = vpop.permute.xlu1 %679  ;;  %v1042_v42 = vrot.slane %v1034_v22, %v3297_v5  ;;  %v4980_v22 = vld [vmem:[#allocation38_spill] sm:$0xff] }
 0x16a   :  { %v925_v33 = vsel %vm910_vm6, %v892_v28, %v678_v36  ;;  %v926_v58 = vsel %vm910_vm6, %v893_v37, %v680_v21  ;;  %v796_v21 = vsel %vm778_vm2, %v763_v2, %v4980_v22 }
 0x16b   :  { %513 = vrot.lane.b32.xlu0 %v3563_v60, %s2660_s25  ;;  %v1035_v39 = vcombine.low %v925_v33, %v926_v58  ;;  %515 = vrot.lane.b32.xlu1 %v3568_v26, %s2660_s25  ;;  %v4981_v33 = vld [vmem:[#allocation19_spill] sm:$0xff]  ;;  %v4982_v58 = vld [vmem:[#allocation12_spill] sm:$0xff] }
 0x16d   :  { %v3736_v11 = vpop.permute.xlu0 %400  ;;  %v1049_v7 = vrot.slane %v1035_v39, %v3297_v5  ;;  %v3749_v43 = vpop.permute.xlu1 %402  ;;  %v762_v39 = vsel %vm745_vm1, %v4982_v58, %v4981_v33 }
 0x16f   :  { %517 = vrot.lane.b32.xlu0 %v3581_v46, %s2660_s25  ;;  %v1050_v31 = vcombine.low %v1042_v42, %v1049_v7  ;;  %519 = vrot.lane.b32.xlu1 %v103_v48, %s2660_s25  ;;  %v4983_v42 = vld [vmem:[#allocation37_spill] sm:$0xff] }
 0x170   :  { %v795_v7 = vsel %vm778_vm2, %v762_v39, %v4983_v42  ;;  %v4989_v42 = vld [vmem:[#allocation41_spill] sm:$0xff] }
 0x171   :  { %v3751_v44 = vpop.permute.xlu0 %404  ;;  %v3756_v29 = vpop.permute.xlu1 %406  ;;  %2511 = vmatmul.mubr.msk.f32.gmra.mrb[2].mxu0 %vm1119_vm7, %v1050_v31  ;;  %v828_v22 = vsel %vm811_vm3, %v795_v7, %v3664_v56 }
 0x173   :  { %601 = vrot.lane.b32.xlu0 %v3397_v27, %s2661_s13  ;;  %603 = vrot.lane.b32.xlu1 %v3414_v15, %s2661_s13 }
 0x175   :  { %v490_v0 = vpop.permute.xlu0 %489  ;;  %v492_v50 = vpop.permute.xlu1 %491 }
 0x177   :  { %605 = vrot.lane.b32.xlu0 %v3459_v32, %s2661_s13  ;;  %607 = vrot.lane.b32.xlu1 %v3472_v18, %s2661_s13  ;;  %v4978_v32 = vmov 0.0  }
 0x179   :  { %v494_v14 = vpop.permute.xlu0 %493  ;;  %v496_v27 = vpop.permute.xlu1 %495 }
 0x17b   :  { %609 = vrot.lane.b32.xlu0 %v3477_v3, %s2661_s13  ;;  %611 = vrot.lane.b32.xlu1 %v3490_v6, %s2661_s13 }
 0x17d   :  { %v3767_v54 = vpop.permute.xlu0 %184  ;;  %v3772_v15 = vpop.permute.xlu1 %186 }
 0x17f   :  { %613 = vrot.lane.b32.xlu0 %v102_v45, %s2661_s13  ;;  %615 = vrot.lane.b32.xlu1 %v4978_v32, %s2661_s13 }
 0x181   :  { %v3774_v4 = vpop.permute.xlu0 %188  ;;  %v3780_v18 = vpop.permute.xlu1 %190 }
 0x183   :  { %697 = vrot.lane.b32.xlu0 %v3508_v47, %s2662_s8  ;;  %699 = vrot.lane.b32.xlu1 %v3519_v16, %s2662_s8 }
 0x185   :  { %v3782_v3 = vpop.permute.xlu0 %497  ;;  %v3788_v6 = vpop.permute.xlu1 %499 }
 0x187   :  { %701 = vrot.lane.b32.xlu0 %v3550_v17, %s2662_s8  ;;  %703 = vrot.lane.b32.xlu1 %v3563_v60, %s2662_s8 }
 0x189   :  { %v3790_v45 = vpop.permute.xlu0 %501  ;;  %v3796_v52 = vpop.permute.xlu1 %503 }
 0x18b   :  { %705 = vrot.lane.b32.xlu0 %v3568_v26, %s2662_s8  ;;  %707 = vrot.lane.b32.xlu1 %v3581_v46, %s2662_s8  ;;  %v4986_v26 = vld [vmem:[#allocation36_spill] sm:$0xff] }
 0x18d   :  { %v586_v20 = vpop.permute.xlu0 %585  ;;  %v588_v51 = vpop.permute.xlu1 %587 }
 0x18f   :  { %709 = vrot.lane.b32.xlu0 %v103_v48, %s2662_s8  ;;  %711 = vrot.lane.b32.xlu1 %v4978_v32, %s2662_s8  ;;  %v829_v48 = vsel %vm811_vm3, %v796_v21, %v3673_v63  ;;  %v4988_v21 = vld [vmem:[#allocation39_spill] sm:$0xff]  ;;  %s2666_s8 = smov 48  }
 0x190   :  { %v862_v31 = vsel %vm844_vm4, %v829_v48, %v492_v50  ;;  %v861_v48 = vsel %vm844_vm4, %v828_v22, %v490_v0 }
 0x191   :  { %v590_v38 = vpop.permute.xlu0 %589  ;;  %v592_v23 = vpop.permute.xlu1 %591  ;;  %v895_v33 = vsel %vm877_vm5, %v862_v31, %v588_v51  ;;  %v894_v51 = vsel %vm877_vm5, %v861_v48, %v586_v20 }
 0x193   :  { %1411 = vrot.lane.b32.xlu0 %v4978_v32, %s2664_s0  ;;  %v4984_v32 = vld [vmem:[#allocation22_spill] sm:$0xff] }
 0x194   :  { %v764_v9 = vsel %vm745_vm1, %v4985_v61, %v4984_v32 }
 0x195   :  { %v3805_v36 = vpop.permute.xlu0 %192  ;;  %v3807_v62 = vpop.permute.xlu1 %194  ;;  %v797_v39 = vsel %vm778_vm2, %v764_v9, %v4988_v21 }
 0x199   :  { %v3809_v13 = vpop.permute.xlu0 %196  ;;  %v3811_v49 = vpop.permute.xlu1 %198 }
 0x19a   :  { %4979 = vst [vmem:[#allocation16_spill] sm:$0xff] %v3811_v49  ;;  %v4987_v49 = vld [vmem:[#allocation21_spill] sm:$0xff] }
 0x19b   :  { %v765_v2 = vsel %vm745_vm1, %v4987_v49, %v4986_v26  ;;  %v830_v26 = vsel %vm811_vm3, %v797_v39, %v3675_v12  ;;  %v4990_v39 = vld [vmem:[#allocation35_spill] sm:$0xff] }
 0x19c   :  { %v798_v50 = vsel %vm778_vm2, %v765_v2, %v4989_v42  ;;  %v863_v49 = vsel %vm844_vm4, %v830_v26, %v494_v14  ;;  %v4991_v42 = vld [vmem:[#allocation29_spill] sm:$0xff] }
 0x19d   :  { %v3813_v46 = vpop.permute.xlu0 %311  ;;  %v3815_v59 = vpop.permute.xlu1 %313  ;;  %v831_v56 = vsel %vm811_vm3, %v798_v50, %v3683_v24  ;;  %v896_v61 = vsel %vm877_vm5, %v863_v49, %v590_v38  ;;  %v767_v50 = vsel %vm745_vm1, %v4991_v42, %v4990_v39 }
 0x19e   :  { %v864_v7 = vsel %vm844_vm4, %v831_v56, %v496_v27  ;;  %v800_v26 = vsel %vm778_vm2, %v767_v50, %v3653_v10  ;;  %v4992_v56 = vld [vmem:[#allocation33_spill] sm:$0xff] }
 0x19f   :  { %v897_v0 = vsel %vm877_vm5, %v864_v7, %v592_v23  ;;  %v833_v7 = vsel %vm811_vm3, %v800_v26, %v3749_v43 }
 0x1a1   :  { %v3817_v30 = vpop.permute.xlu0 %315  ;;  %v3819_v53 = vpop.permute.xlu1 %317 }
 0x1a5   :  { %v3821_v57 = vpop.permute.xlu0 %593  ;;  %v596_v1 = vpop.permute.xlu1 %595 }
 0x1a9   :  { %v3823_v19 = vpop.permute.xlu0 %597  ;;  %v3828_v28 = vpop.permute.xlu1 %599 }
 0x1ad   :  { %v682_v37 = vpop.permute.xlu0 %681  ;;  %v684_v58 = vpop.permute.xlu1 %683 }
 0x1ae   :  { %v928_v32 = vsel %vm910_vm6, %v895_v33, %v684_v58  ;;  %v927_v31 = vsel %vm910_vm6, %v894_v51, %v682_v37  ;;  %v4993_v51 = vld [vmem:[#allocation23_spill] sm:$0xff] }
 0x1af   :  { %v1051_v9 = vcombine.low %v927_v31, %v928_v32  ;;  %v766_v49 = vsel %vm745_vm1, %v4993_v51, %v4992_v56 }
 0x1b0   :  { %v799_v31 = vsel %vm778_vm2, %v766_v49, %v3643_v41 }
 0x1b1   :  { %v686_v63 = vpop.permute.xlu0 %685  ;;  %v688_v2 = vpop.permute.xlu1 %687  ;;  %v1059_v20 = vrot.slane %v1051_v9, %v3297_v5  ;;  %v4995_v9 = vld [vmem:[#allocation32_spill] sm:$0xff] }
 0x1b2   :  { %v929_v12 = vsel %vm910_vm6, %v896_v61, %v686_v63  ;;  %v930_v24 = vsel %vm910_vm6, %v897_v0, %v688_v2  ;;  %v866_v61 = vsel %vm844_vm4, %v833_v7, %v3788_v6  ;;  %v4994_v0 = vld [vmem:[#allocation13_spill] sm:$0xff] }
 0x1b3   :  { %v1052_v33 = vcombine.low %v929_v12, %v930_v24  ;;  %v768_v2 = vsel %vm745_vm1, %v4995_v9, %v4994_v0  ;;  %v4996_v12 = vld [vmem:[#allocation14_spill] sm:$0xff]  ;;  %v832_v24 = vsel %vm811_vm3, %v799_v31, %v3736_v11 }
 0x1b4   :  { %v769_v10 = vsel %vm745_vm1, %v4943_v40, %v4996_v12  ;;  %v801_v41 = vsel %vm778_vm2, %v768_v2, %v3655_v34 }
 0x1b5   :  { %v3865_v22 = vpop.permute.xlu0 %319  ;;  %v1066_v14 = vrot.slane %v1052_v33, %v3297_v5  ;;  %v3871_v27 = vpop.permute.xlu1 %321  ;;  %v899_v33 = vsel %vm877_vm5, %v866_v61, %v596_v1  ;;  %v802_v6 = vsel %vm778_vm2, %v769_v10, %v3661_v35  ;;  %v834_v40 = vsel %vm811_vm3, %v801_v41, %v3751_v44 }
 0x1b6   :  { %v835_v11 = vsel %vm811_vm3, %v802_v6, %v3756_v29  ;;  %v867_v34 = vsel %vm844_vm4, %v834_v40, %v3790_v45 }
 0x1b7   :  { %v1067_v38 = vcombine.low %v1059_v20, %v1066_v14  ;;  %v865_v14 = vsel %vm844_vm4, %v832_v24, %v3782_v3  ;;  %v868_v35 = vsel %vm844_vm4, %v835_v11, %v3796_v52  ;;  %v900_v3 = vsel %vm877_vm5, %v867_v34, %v3823_v19  ;;  %v3955_v24 = vld [vmem:[%s4870_s2] ss:$0 sm:$0xff]  ;;  %s2665_s2 = smov 32  }
 0x1b8   :  { %v898_v1 = vsel %vm877_vm5, %v865_v14, %v3821_v57  ;;  %v901_v44 = vsel %vm877_vm5, %v868_v35, %v3828_v28 }
 0x1b9   :  { %v3873_v37 = vpop.permute.xlu0 %323  ;;  %v3875_v58 = vpop.permute.xlu1 %325  ;;  %2513 = vmatprep.mubr.msk.f32.mxu0 %vm1119_vm7, %v1067_v38 }
 0x1bd   :  { %v3878_v23 = vpop.permute.xlu0 %408  ;;  %v3880_v21 = vpop.permute.xlu1 %410 }
 0x1c1   :  { %v3882_v63 = vpop.permute.xlu0 %412  ;;  %v3887_v48 = vpop.permute.xlu1 %414 }
 0x1c5   :  { %v690_v32 = vpop.permute.xlu0 %689  ;;  %v692_v43 = vpop.permute.xlu1 %691 }
 0x1c6   :  { %v932_v38 = vsel %vm910_vm6, %v899_v33, %v692_v43  ;;  %v931_v39 = vsel %vm910_vm6, %v898_v1, %v690_v32 }
 0x1c7   :  { %v1068_v42 = vcombine.low %v931_v39, %v932_v38 }
 0x1c9   :  { %v694_v20 = vpop.permute.xlu0 %693  ;;  %v696_v50 = vpop.permute.xlu1 %695  ;;  %v1076_v56 = vrot.slane %v1068_v42, %v3297_v5 }
 0x1ca   :  { %v933_v57 = vsel %vm910_vm6, %v900_v3, %v694_v20  ;;  %v934_v26 = vsel %vm910_vm6, %v901_v44, %v696_v50 }
 0x1cb   :  { %v1069_v45 = vcombine.low %v933_v57, %v934_v26  ;;  %v771_v26 = vsel %vm745_vm1, %v3438_v8, %v3772_v15  ;;  %v772_v15 = vsel %vm745_vm1, %v3503_v55, %v3774_v4 }
 0x1cd   :  { %v3931_v29 = vpop.permute.xlu0 %416  ;;  %v1083_v52 = vrot.slane %v1069_v45, %v3297_v5  ;;  %v3937_v32 = vpop.permute.xlu1 %418 }
 0x1cf   :  { %v1084_v19 = vcombine.low %v1076_v56, %v1083_v52  ;;  %v804_v56 = vsel %vm778_vm2, %v771_v26, %v3815_v59  ;;  %v773_v59 = vsel %vm745_vm1, %v3508_v47, %v3780_v18 }
 0x1d1   :  { %v3939_v51 = vpop.permute.xlu0 %420  ;;  %v3941_v49 = vpop.permute.xlu1 %422  ;;  %2514 = vmatmul.mubr.msk.f32.gmra.mrb[4].mxu0 %vm1119_vm7, %v1084_v19  ;;  %v770_v19 = vsel %vm745_vm1, %v4944_v25, %v3767_v54 }
 0x1d5   :  { %v506_v28 = vpop.permute.xlu0 %505  ;;  %v508_v7 = vpop.permute.xlu1 %507 }
 0x1d9   :  { %v510_v31 = vpop.permute.xlu0 %509  ;;  %v512_v61 = vpop.permute.xlu1 %511 }
 0x1dd   :  { %v3944_v0 = vpop.permute.xlu0 %513  ;;  %v3946_v9 = vpop.permute.xlu1 %515 }
 0x1e1   :  { %v3948_v2 = vpop.permute.xlu0 %517  ;;  %v3950_v12 = vpop.permute.xlu1 %519 }
 0x1e4   :  { %v2509_v33 = vpop.f32.mrb[0].mxu0 }
 0x1e5   :  { %v602_v10 = vpop.permute.xlu0 %601  ;;  %v1212_v43 = vadd.f32 %v2509_v33, %v3955_v24  ;;  %v604_v20 = vpop.permute.xlu1 %603  ;;  %v837_v33 = vsel %vm811_vm3, %v804_v56, %v3880_v21  ;;  %v805_v21 = vsel %vm778_vm2, %v772_v15, %v3817_v30 }
 0x1e6   :  { %v1206_v41 = vpop.f32.mrb[1].mxu0  ;;  %v870_v8 = vsel %vm844_vm4, %v837_v33, %v508_v7  ;;  %v838_v47 = vsel %vm811_vm3, %v805_v21, %v3882_v63 }
 0x1e7   :  { %v1207_v6 = vadd.f32 %v3955_v24, %v1206_v41  ;;  %v1246_v38 = vmax.f32 %v1212_v43, 0.0  ;;  %v803_v43 = vsel %vm778_vm2, %v770_v19, %v3813_v46  ;;  %v903_v25 = vsel %vm877_vm5, %v870_v8, %v604_v20 }
 0x1e8   :  { %v836_v41 = vsel %vm811_vm3, %v803_v43, %v3878_v23  ;;  %v806_v46 = vsel %vm778_vm2, %v773_v59, %v3819_v53  ;;  %v871_v20 = vsel %vm844_vm4, %v838_v47, %v510_v31  ;;  %v775_v53 = vsel %vm745_vm1, %v3550_v17, %v3807_v62 }
 0x1e9   :  { %v606_v14 = vpop.permute.xlu0 %605  ;;  %v1245_v40 = vmax.f32 %v1207_v6, 0.0  ;;  %v608_v11 = vpop.permute.xlu1 %607  ;;  %v1278_v39 = vcombine.high %v1246_v38, %v1246_v38  ;;  %v3970_v42 = vrot.slane %v1246_v38, %v3297_v5  ;;  %v869_v7 = vsel %vm844_vm4, %v836_v41, %v506_v28 }
 0x1ea   :  { %v839_v18 = vsel %vm811_vm3, %v806_v46, %v3887_v48  ;;  %v902_v23 = vsel %vm877_vm5, %v869_v7, %v602_v10  ;;  %v904_v28 = vsel %vm877_vm5, %v871_v20, %v606_v14  ;;  %v808_v48 = vsel %vm778_vm2, %v775_v53, %v3871_v27 }
 0x1eb   :  { %v1261_v1 = vcombine.high %v1245_v40, %v1245_v40  ;;  %v3960_v34 = vrot.slane %v1245_v40, %v3297_v5  ;;  %v3977_v57 = vrot.slane %v1278_v39, %v3297_v5  ;;  %v872_v30 = vsel %vm844_vm4, %v839_v18, %v512_v61  ;;  %v4998_v39 = vld [vmem:[#allocation40_spill] sm:$0xff] }
 0x1ec   :  { %v905_v38 = vsel %vm877_vm5, %v872_v30, %v608_v11  ;;  %v841_v17 = vsel %vm811_vm3, %v808_v48, %v3937_v32  ;;  %v776_v14 = vsel %vm745_vm1, %v3563_v60, %v3809_v13  ;;  %v4997_v11 = vld [vmem:[#allocation16_spill] sm:$0xff]  ;;  %v4999_v20 = vmov 0.0  }
 0x1ed   :  { %v3962_v35 = vpop.permute.xlu0 %609  ;;  %v3965_v3 = vrot.slane %v1261_v1, %v3297_v5  ;;  %1413 = vrot.lane.b32.xlu1 %v3960_v34, %s2664_s0  ;;  %v612_v44 = vpop.permute.xlu1 %611  ;;  %v774_v1 = vsel %vm745_vm1, %v3519_v16, %v3805_v36  ;;  %v777_v27 = vsel %vm745_vm1, %v4998_v39, %v4997_v11  ;;  %v874_v56 = vsel %vm844_vm4, %v841_v17, %v3946_v9 }
 0x1ee   :  { %v807_v26 = vsel %vm778_vm2, %v774_v1, %v3865_v22  ;;  %v907_v36 = vsel %vm877_vm5, %v874_v56, %v612_v44  ;;  %v809_v13 = vsel %vm778_vm2, %v776_v14, %v3873_v37  ;;  %v810_v19 = vsel %vm778_vm2, %v777_v27, %v3875_v58 }
 0x1ef   :  { %1415 = vrot.lane.b32.xlu0 %v3965_v3, %s2664_s0  ;;  %v840_v16 = vsel %vm811_vm3, %v807_v26, %v3931_v29  ;;  %v842_v29 = vsel %vm811_vm3, %v809_v13, %v3939_v51  ;;  %v843_v44 = vsel %vm811_vm3, %v810_v19, %v3941_v49  ;;  %v4096_v30 = vcombine.high %v3960_v34, %v3960_v34 }
 0x1f0   :  { %v873_v22 = vsel %vm844_vm4, %v840_v16, %v3944_v0  ;;  %v875_v37 = vsel %vm844_vm4, %v842_v29, %v3948_v2  ;;  %v876_v58 = vsel %vm844_vm4, %v843_v44, %v3950_v12  ;;  %v4108_v53 = vcombine.high %v3970_v42, %v3970_v42 }
 0x1f1   :  { %v3972_v50 = vpop.permute.xlu0 %613  ;;  %1417 = vrot.lane.b32.xlu1 %v3970_v42, %s2664_s0  ;;  %v616_v45 = vpop.permute.xlu1 %615  ;;  %v906_v33 = vsel %vm877_vm5, %v873_v22, %v3962_v35  ;;  %vm2257_vm1 = vcmask 326656   ;;  %vm2330_vm2 = vcmask 457728   ;;  %vm2444_vm3 = vcmask 125952  }
 0x1f2   :  { %v908_v15 = vsel %vm877_vm5, %v875_v37, %v3972_v50  ;;  %v909_v51 = vsel %vm877_vm5, %v876_v58, %v616_v45 }
 0x1f3   :  { %1419 = vrot.lane.b32.xlu0 %v3977_v57, %s2664_s0 }
 0x1f5   :  { %v698_v52 = vpop.permute.xlu0 %697  ;;  %v700_v54 = vpop.permute.xlu1 %699 }
 0x1f6   :  { %v936_v55 = vsel %vm910_vm6, %v903_v25, %v700_v54  ;;  %v935_v6 = vsel %vm910_vm6, %v902_v23, %v698_v52 }
 0x1f7   :  { %v1085_v63 = vcombine.low %v935_v6, %v936_v55  ;;  %v4102_v6 = vcombine.high %v3965_v3, %v3965_v3 }
 0x1f9   :  { %v702_v4 = vpop.permute.xlu0 %701  ;;  %v704_v40 = vpop.permute.xlu1 %703  ;;  %v1093_v32 = vrot.slane %v1085_v63, %v3297_v5 }
 0x1fa   :  { %v937_v10 = vsel %vm910_vm6, %v904_v28, %v702_v4  ;;  %v938_v31 = vsel %vm910_vm6, %v905_v38, %v704_v40  ;;  %v4114_v28 = vcombine.high %v3977_v57, %v3977_v57 }
 0x1fb   :  { %v1086_v62 = vcombine.low %v937_v10, %v938_v31 }
 0x1fd   :  { %v706_v61 = vpop.permute.xlu0 %705  ;;  %v1100_v52 = vrot.slane %v1086_v62, %v3297_v5  ;;  %v708_v60 = vpop.permute.xlu1 %707 }
 0x1fe   :  { %v940_v9 = vsel %vm910_vm6, %v907_v36, %v708_v60  ;;  %v939_v0 = vsel %vm910_vm6, %v906_v33, %v706_v61 }
 0x1ff   :  { %v1101_v43 = vcombine.low %v1093_v32, %v1100_v52  ;;  %v1102_v59 = vcombine.low %v939_v0, %v940_v9 }
 0x201   :  { %v710_v8 = vpop.permute.xlu0 %709  ;;  %v712_v49 = vpop.permute.xlu1 %711  ;;  %2516 = vmatprep.mubr.msk.f32.mxu0 %vm1119_vm7, %v1101_v43  ;;  %v1110_v2 = vrot.slane %v1102_v59, %v3297_v5  ;;  %v1802_v59 = vld [vmem:[%s4871_s3 + $0x8] sm:$0xff] }
 0x202   :  { %v941_v35 = vsel %vm910_vm6, %v908_v15, %v710_v8  ;;  %v942_v41 = vsel %vm910_vm6, %v909_v51, %v712_v49  ;;  %v1801_v51 = vld [vmem:[%s4871_s3] sm:$0xff] }
 0x203   :  { %v1103_v25 = vcombine.low %v941_v35, %v942_v41  ;;  %v2570_v49 = vpack.c.bf16 %v1802_v59, %v1801_v51  ;;  %v1803_v41 = vld [vmem:[%s4871_s3 + $0x10] sm:$0xff] }
 0x205   :  { %v1117_v12 = vrot.slane %v1103_v25, %v3297_v5  ;;  %v4209_v60 = vpop.permute.xlu0 %1411  ;;  %2571 = vmatprep.subr.bf16.mxu1 %v2570_v49  ;;  %v1804_v25 = vld [vmem:[%s4871_s3 + $0x18] sm:$0xff] }
 0x206   :  { %5000 = vst [vmem:[#allocation6_spill] sm:$0xff] %v4209_v60  ;;  %2573 = vmatpush3.bf16.msra.mxu1 %v2570_v49 }
 0x207   :  { %v1118_v54 = vcombine.low %v1110_v2, %v1117_v12  ;;  %v2574_v2 = vpack.c.bf16 %v1804_v25, %v1803_v41 }
 0x209   :  { %2517 = vmatmul.mubr.msk.f32.gmra.mrb[6].mxu0 %vm1119_vm7, %v1118_v54  ;;  %2575 = vmatprep.subr.bf16.mxu1 %v2574_v2 }
 0x20a   :  { %2577 = vmatpush3.bf16.msra.mxu1 %v2574_v2 }
 0x244   :  { %v2512_v21 = vpop.f32.mrb[2].mxu0 }
 0x245   :  { %v1216_v50 = vpop.f32.mrb[3].mxu0  ;;  %v1222_v45 = vadd.f32 %v2512_v21, %v3955_v24  ;;  %v1805_v21 = vld [vmem:[%s4871_s3 + $0x20] sm:$0xff] }
 0x246   :  { %v1217_v46 = vadd.f32 %v3955_v24, %v1216_v50  ;;  %v1806_v50 = vld [vmem:[%s4871_s3 + $0x28] sm:$0xff] }
 0x247   :  { %v1248_v55 = vmax.f32 %v1222_v45, 0.0  ;;  %v2578_v45 = vpack.c.bf16 %v1806_v50, %v1805_v21 }
 0x248   :  { %v1247_v7 = vmax.f32 %v1217_v46, 0.0 }
 0x249   :  { %v4086_v23 = vrot.slane %v1248_v55, %v3297_v5  ;;  %v1312_v48 = vcombine.high %v1248_v55, %v1248_v55  ;;  %2579 = vmatprep.subr.bf16.mxu1 %v2578_v45  ;;  %v1807_v55 = vld [vmem:[%s4871_s3 + $0x30] sm:$0xff] }
 0x24a   :  { %v1295_v4 = vcombine.high %v1247_v7, %v1247_v7  ;;  %v4078_v47 = vrot.slane %v1247_v7, %v3297_v5  ;;  %2581 = vmatpush3.bf16.msra.mxu1 %v2578_v45 }
 0x24b   :  { %v4132_v40 = vcombine.high %v4086_v23, %v4086_v23  ;;  %v4149_v10 = vrot.slane %v1312_v48, %v3297_v5 }
 0x24c   :  { %v4081_v18 = vrot.slane %v1295_v4, %v3297_v5  ;;  %1421 = vrot.lane.b32.xlu1 %v4078_v47, %s2664_s0  ;;  %v4120_v38 = vcombine.high %v4078_v47, %v4078_v47  ;;  %v1808_v4 = vld [vmem:[%s4871_s3 + $0x38] sm:$0xff] }
 0x24d   :  { %v4190_v26 = vcombine.high %v4149_v10, %v4149_v10 }
 0x24e   :  { %1423 = vrot.lane.b32.xlu0 %v4081_v18, %s2664_s0  ;;  %v4126_v63 = vcombine.high %v4081_v18, %v4081_v18 }
 0x250   :  { %1425 = vrot.lane.b32.xlu1 %v4086_v23, %s2664_s0 }
 0x252   :  { %1459 = vrot.lane.b32.xlu0 %v4999_v20, %s2665_s2 }
 0x254   :  { %1461 = vrot.lane.b32.xlu1 %v4096_v30, %s2665_s2 }
 0x256   :  { %1463 = vrot.lane.b32.xlu0 %v4102_v6, %s2665_s2 }
 0x258   :  { %1465 = vrot.lane.b32.xlu1 %v4108_v53, %s2665_s2 }
 0x25a   :  { %1467 = vrot.lane.b32.xlu0 %v4114_v28, %s2665_s2 }
 0x25c   :  { %1469 = vrot.lane.b32.xlu1 %v4120_v38, %s2665_s2 }
 0x25e   :  { %1471 = vrot.lane.b32.xlu0 %v4126_v63, %s2665_s2 }
 0x25f   :  { %v4216_v22 = vpop.permute.xlu1 %1413 }
 0x260   :  { %1473 = vrot.lane.b32.xlu1 %v4132_v40, %s2665_s2 }
 0x261   :  { %v4223_v29 = vpop.permute.xlu0 %1415 }
 0x262   :  { %1507 = vrot.lane.b32.xlu0 %v3960_v34, %s2666_s8 }
 0x263   :  { %v4233_v44 = vpop.permute.xlu1 %1417 }
 0x264   :  { %1509 = vrot.lane.b32.xlu1 %v3965_v3, %s2666_s8 }
 0x265   :  { %v4241_v43 = vpop.permute.xlu0 %1419 }
 0x266   :  { %1511 = vrot.lane.b32.xlu0 %v3970_v42, %s2666_s8 }
 0x268   :  { %1513 = vrot.lane.b32.xlu1 %v3977_v57, %s2666_s8 }
 0x26a   :  { %1515 = vrot.lane.b32.xlu0 %v4078_v47, %s2666_s8 }
 0x26c   :  { %1517 = vrot.lane.b32.xlu1 %v4081_v18, %s2666_s8 }
 0x26e   :  { %1519 = vrot.lane.b32.xlu0 %v4086_v23, %s2666_s8 }
 0x270   :  { %1521 = vrot.lane.b32.xlu1 %v4149_v10, %s2666_s8 }
 0x272   :  { %1555 = vrot.lane.b32.xlu0 %v4096_v30, %s2667_s14 }
 0x274   :  { %1557 = vrot.lane.b32.xlu1 %v4102_v6, %s2667_s14 }
 0x276   :  { %1559 = vrot.lane.b32.xlu0 %v4108_v53, %s2667_s14 }
 0x278   :  { %1561 = vrot.lane.b32.xlu1 %v4114_v28, %s2667_s14 }
 0x27a   :  { %1427 = vrot.lane.b32.xlu0 %v4149_v10, %s2664_s0 }
 0x2a4   :  { %v2515_v34 = vpop.f32.mrb[4].mxu0 }
 0x2a5   :  { %v1226_v31 = vpop.f32.mrb[5].mxu0  ;;  %v1232_v61 = vadd.f32 %v2515_v34, %v3955_v24  ;;  %v1810_v34 = vld [vmem:[%s4871_s3 + $0x48] sm:$0xff] }
 0x2a6   :  { %v1227_v1 = vadd.f32 %v3955_v24, %v1226_v31 }
 0x2a7   :  { %v1250_v62 = vmax.f32 %v1232_v61, 0.0 }
 0x2a8   :  { %v1249_v17 = vmax.f32 %v1227_v1, 0.0 }
 0x2a9   :  { %v4176_v27 = vrot.slane %v1250_v62, %v3297_v5  ;;  %v1346_v56 = vcombine.high %v1250_v62, %v1250_v62  ;;  %v1811_v62 = vld [vmem:[%s4871_s3 + $0x50] sm:$0xff] }
 0x2aa   :  { %v1329_v14 = vcombine.high %v1249_v17, %v1249_v17  ;;  %v4168_v11 = vrot.slane %v1249_v17, %v3297_v5 }
 0x2ab   :  { %v4201_v16 = vrot.slane %v1346_v56, %v3297_v5  ;;  %v4255_v58 = vcombine.high %v4176_v27, %v4176_v27 }
 0x2ac   :  { %v4171_v39 = vrot.slane %v1329_v14, %v3297_v5  ;;  %1429 = vrot.lane.b32.xlu1 %v4168_v11, %s2664_s0  ;;  %v4239_v33 = vcombine.high %v4168_v11, %v4168_v11  ;;  %v1812_v14 = vld [vmem:[%s4871_s3 + $0x58] sm:$0xff] }
 0x2ad   :  { %5001 = vst [vmem:[#allocation30_spill] sm:$0xff] %v4255_v58  ;;  %v4307_v7 = vcombine.high %v4201_v16, %v4201_v16  ;;  %v2590_v56 = vpack.c.bf16 %v1812_v14, %v1811_v62 }
 0x2ae   :  { %1431 = vrot.lane.b32.xlu0 %v4171_v39, %s2664_s0  ;;  %v4247_v8 = vcombine.high %v4171_v39, %v4171_v39 }
 0x2af   :  { %5002 = vst [vmem:[#allocation15_spill] sm:$0xff] %v4307_v7 }
 0x2b0   :  { %1433 = vrot.lane.b32.xlu1 %v4176_v27, %s2664_s0 }
 0x2b2   :  { %1563 = vrot.lane.b32.xlu0 %v4120_v38, %s2667_s14 }
 0x2b4   :  { %1565 = vrot.lane.b32.xlu1 %v4126_v63, %s2667_s14 }
 0x2b6   :  { %1567 = vrot.lane.b32.xlu0 %v4132_v40, %s2667_s14 }
 0x2b8   :  { %1569 = vrot.lane.b32.xlu1 %v4190_v26, %s2667_s14 }
 0x2ba   :  { %1603 = vrot.lane.b32.xlu0 %v3965_v3, %s2668_s16 }
 0x2bc   :  { %1605 = vrot.lane.b32.xlu1 %v3970_v42, %s2668_s16 }
 0x2be   :  { %1607 = vrot.lane.b32.xlu0 %v3977_v57, %s2668_s16  ;;  %v4249_v37 = vpop.permute.xlu1 %1421 }
 0x2c0   :  { %1609 = vrot.lane.b32.xlu1 %v4078_v47, %s2668_s16  ;;  %v4257_v0 = vpop.permute.xlu0 %1423  ;;  %v2582_v47 = vpack.c.bf16 %v1808_v4, %v1807_v55 }
 0x2c2   :  { %1435 = vrot.lane.b32.xlu0 %v4201_v16, %s2664_s0  ;;  %v4263_v15 = vpop.permute.xlu1 %1425  ;;  %2583 = vmatprep.subr.bf16.mxu1 %v2582_v47 }
 0x2c3   :  { %2585 = vmatpush3.bf16.msra.mxu1 %v2582_v47 }
 0x2c4   :  { %v4273_v35 = vpop.permute.xlu0 %1459 }
 0x2c6   :  { %v4285_v12 = vpop.permute.xlu1 %1461 }
 0x2c8   :  { %v4289_v54 = vpop.permute.xlu0 %1463 }
 0x2ca   :  { %v4301_v46 = vpop.permute.xlu1 %1465 }
 0x2ce   :  { %v4335_v61 = vpop.permute.xlu1 %1469 }
 0x2dc   :  { %v2518_v36 = vpop.f32.mrb[6].mxu0 }
 0x2dd   :  { %v1236_v32 = vpop.f32.mrb[7].mxu0  ;;  %v1242_v3 = vadd.f32 %v2518_v36, %v3955_v24  ;;  %v4355_v36 = vpop.permute.xlu1 %1473 }
 0x2de   :  { %v1237_v52 = vadd.f32 %v3955_v24, %v1236_v32  ;;  %v1813_v32 = vld [vmem:[%s4871_s3 + $0x60] sm:$0xff] }
 0x2df   :  { %v4211_v13 = vmax.f32 %v1242_v3, 0.0  ;;  %v1814_v3 = vld [vmem:[%s4871_s3 + $0x68] sm:$0xff] }
 0x2e0   :  { %v1251_v42 = vmax.f32 %v1237_v52, 0.0  ;;  %v2594_v52 = vpack.c.bf16 %v1814_v3, %v1813_v32 }
 0x2e1   :  { %v4227_v24 = vrot.slane %v4211_v13, %v3297_v5  ;;  %v1380_v59 = vcombine.high %v4211_v13, %v4211_v13 }
 0x2e2   :  { %v1363_v57 = vcombine.high %v1251_v42, %v1251_v42  ;;  %v4214_v19 = vrot.slane %v1251_v42, %v3297_v5 }
 0x2e3   :  { %v4341_v1 = vcombine.high %v4227_v24, %v4227_v24  ;;  %v1394_v41 = vrot.slane %v1380_v59, %v3297_v5 }
 0x2e4   :  { %v4219_v9 = vrot.slane %v1363_v57, %v3297_v5  ;;  %1437 = vrot.lane.b32.xlu1 %v4214_v19, %s2664_s0 }
 0x2e5   :  { %v1396_v55 = vcombine.high %v1394_v41, %v1394_v41 }
 0x2e6   :  { %1439 = vrot.lane.b32.xlu0 %v4219_v9, %s2664_s0  ;;  %v4327_v48 = vcombine.high %v4219_v9, %v4219_v9 }
 0x2e8   :  { %1441 = vrot.lane.b32.xlu1 %v4227_v24, %s2664_s0  ;;  %5004 = vst [vmem:[#allocation28_spill] sm:$0xff] %v4327_v48 }
 0x2ea   :  { %1475 = vrot.lane.b32.xlu0 %v4190_v26, %s2665_s2 }
 0x2ec   :  { %1477 = vrot.lane.b32.xlu1 %v4239_v33, %s2665_s2 }
 0x2ee   :  { %1479 = vrot.lane.b32.xlu0 %v4247_v8, %s2665_s2 }
 0x2f0   :  { %1481 = vrot.lane.b32.xlu1 %v4255_v58, %s2665_s2 }
 0x2f2   :  { %1611 = vrot.lane.b32.xlu0 %v4081_v18, %s2668_s16  ;;  %v4315_v18 = vpop.permute.xlu0 %1467 }
 0x2f4   :  { %1613 = vrot.lane.b32.xlu1 %v4086_v23, %s2668_s16  ;;  %v4321_v23 = vcombine.high %v4214_v19, %v4214_v19 }
 0x2f6   :  { %1615 = vrot.lane.b32.xlu0 %v4149_v10, %s2668_s16  ;;  %5003 = vst [vmem:[#allocation5_spill] sm:$0xff] %v4321_v23  ;;  %v1809_v10 = vld [vmem:[%s4871_s3 + $0x40] sm:$0xff]  ;;  %v4343_v17 = vpop.permute.xlu0 %1471  ;;  %s2670_s3 = smov 40  }
 0x2f7   :  { %v2586_v31 = vpack.c.bf16 %v1810_v34, %v1809_v10 }
 0x2f8   :  { %1617 = vrot.lane.b32.xlu1 %v4168_v11, %s2668_s16 }
 0x2f9   :  { %2587 = vmatprep.subr.bf16.mxu1 %v2586_v31 }
 0x2fa   :  { %1651 = vrot.lane.b32.xlu0 %v4102_v6, %s2669_s23  ;;  %2589 = vmatpush3.bf16.msra.mxu1 %v2586_v31  ;;  %v4365_v42 = vpop.permute.xlu0 %1507 }
 0x2fb   :  { %2591 = vmatprep.subr.bf16.mxu1 %v2590_v56 }
 0x2fc   :  { %1653 = vrot.lane.b32.xlu1 %v4108_v53, %s2669_s23 }
 0x2fe   :  { %1655 = vrot.lane.b32.xlu0 %v4114_v28, %s2669_s23  ;;  %2593 = vmatpush3.bf16.msra.mxu1 %v2590_v56  ;;  %v4375_v57 = vpop.permute.xlu0 %1511 }
 0x2ff   :  { %2595 = vmatprep.subr.bf16.mxu1 %v2594_v52 }
 0x300   :  { %1657 = vrot.lane.b32.xlu1 %v4120_v38, %s2669_s23 }
 0x302   :  { %1483 = vrot.lane.b32.xlu0 %v4307_v7, %s2665_s2  ;;  %2597 = vmatpush3.bf16.msra.mxu1 %v2594_v52  ;;  %v4387_v49 = vpop.permute.xlu0 %1515 }
 0x304   :  { %1485 = vrot.lane.b32.xlu1 %v4321_v23, %s2665_s2 }
 0x306   :  { %1487 = vrot.lane.b32.xlu0 %v4327_v48, %s2665_s2  ;;  %v4398_v2 = vpop.permute.xlu0 %1519 }
 0x308   :  { %1489 = vrot.lane.b32.xlu1 %v4341_v1, %s2665_s2 }
 0x30a   :  { %1523 = vrot.lane.b32.xlu0 %v4168_v11, %s2666_s8  ;;  %v4371_v11 = vpop.permute.xlu1 %1509  ;;  %v4407_v21 = vpop.permute.xlu0 %1555 }
 0x30c   :  { %1525 = vrot.lane.b32.xlu1 %v4171_v39, %s2666_s8 }
 0x30e   :  { %1527 = vrot.lane.b32.xlu0 %v4176_v27, %s2666_s8  ;;  %v4381_v51 = vpop.permute.xlu1 %1513  ;;  %v4417_v45 = vpop.permute.xlu0 %1559 }
 0x310   :  { %1529 = vrot.lane.b32.xlu1 %v4201_v16, %s2666_s8 }
 0x312   :  { %1659 = vrot.lane.b32.xlu0 %v4126_v63, %s2669_s23  ;;  %v4394_v25 = vpop.permute.xlu1 %1517  ;;  %v4426_v47 = vpop.permute.xlu0 %1427 }
 0x314   :  { %1661 = vrot.lane.b32.xlu1 %v4132_v40, %s2669_s23 }
 0x316   :  { %1663 = vrot.lane.b32.xlu0 %v4190_v26, %s2669_s23  ;;  %v4403_v13 = vpop.permute.xlu1 %1521 }
 0x318   :  { %1665 = vrot.lane.b32.xlu1 %v4239_v33, %s2669_s23 }
 0x31a   :  { %1531 = vrot.lane.b32.xlu0 %v4214_v19, %s2666_s8  ;;  %v4413_v50 = vpop.permute.xlu1 %1557 }
 0x31c   :  { %1533 = vrot.lane.b32.xlu1 %v4219_v9, %s2666_s8 }
 0x31e   :  { %1535 = vrot.lane.b32.xlu0 %v4227_v24, %s2666_s8  ;;  %v4423_v4 = vpop.permute.xlu1 %1561 }
 0x320   :  { %1537 = vrot.lane.b32.xlu1 %v1394_v41, %s2666_s8  ;;  %v1432_v34 = vpop.permute.xlu0 %1431 }
 0x322   :  { %1571 = vrot.lane.b32.xlu0 %v4239_v33, %s2667_s14  ;;  %v4430_v10 = vpop.permute.xlu1 %1429 }
 0x324   :  { %1573 = vrot.lane.b32.xlu1 %v4247_v8, %s2667_s14  ;;  %v4442_v62 = vpop.permute.xlu0 %1563 }
 0x326   :  { %1575 = vrot.lane.b32.xlu0 %v4255_v58, %s2667_s14  ;;  %v4438_v31 = vpop.permute.xlu1 %1433 }
 0x328   :  { %1577 = vrot.lane.b32.xlu1 %v4307_v7, %s2667_s14 }
 0x32a   :  { %1579 = vrot.lane.b32.xlu0 %v4321_v23, %s2667_s14 }
 0x32c   :  { %1581 = vrot.lane.b32.xlu1 %v4327_v48, %s2667_s14 }
 0x32e   :  { %1583 = vrot.lane.b32.xlu0 %v4341_v1, %s2667_s14 }
 0x330   :  { %1585 = vrot.lane.b32.xlu1 %v1396_v55, %s2667_s14 }
 0x332   :  { %1619 = vrot.lane.b32.xlu0 %v4171_v39, %s2668_s16  ;;  %v4447_v39 = vpop.permute.xlu1 %1565 }
 0x334   :  { %1621 = vrot.lane.b32.xlu1 %v4176_v27, %s2668_s16  ;;  %v4451_v27 = vpop.permute.xlu0 %1567 }
 0x336   :  { %1623 = vrot.lane.b32.xlu0 %v4201_v16, %s2668_s16  ;;  %v4457_v16 = vpop.permute.xlu1 %1569 }
 0x338   :  { %1625 = vrot.lane.b32.xlu1 %v4214_v19, %s2668_s16  ;;  %v1604_v19 = vpop.permute.xlu0 %1603 }
 0x33a   :  { %1627 = vrot.lane.b32.xlu0 %v4219_v9, %s2668_s16  ;;  %v1606_v9 = vpop.permute.xlu1 %1605 }
 0x33c   :  { %1629 = vrot.lane.b32.xlu1 %v4227_v24, %s2668_s16  ;;  %v1608_v24 = vpop.permute.xlu0 %1607 }
 0x33e   :  { %1631 = vrot.lane.b32.xlu0 %v1394_v41, %s2668_s16  ;;  %v1610_v14 = vpop.permute.xlu1 %1609  ;;  %v1710_v41 = vsel %vm1699_vm8, %v4239_v33, %v1432_v34 }
 0x340   :  { %1633 = vrot.lane.b32.xlu1 %v4999_v20, %s2668_s16  ;;  %v4472_v56 = vpop.permute.xlu0 %1435 }
 0x342   :  { %1667 = vrot.lane.b32.xlu0 %v4247_v8, %s2669_s23 }
 0x344   :  { %1669 = vrot.lane.b32.xlu1 %v4255_v58, %s2669_s23 }
 0x346   :  { %1671 = vrot.lane.b32.xlu0 %v4307_v7, %s2669_s23 }
 0x348   :  { %1673 = vrot.lane.b32.xlu1 %v4321_v23, %s2669_s23 }
 0x34a   :  { %1675 = vrot.lane.b32.xlu0 %v4327_v48, %s2669_s23 }
 0x34c   :  { %1677 = vrot.lane.b32.xlu1 %v4341_v1, %s2669_s23 }
 0x34e   :  { %1679 = vrot.lane.b32.xlu0 %v1396_v55, %s2669_s23 }
 0x350   :  { %1681 = vrot.lane.b32.xlu1 %v4999_v20, %s2669_s23  ;;  %s2671_s23 = smov 24  }
 0x352   :  { %2082 = vrot.lane.b32.xlu0 %v4999_v20, %s2655_s12 }
 0x356   :  { %v4474_v32 = vpop.permute.xlu1 %1437 }
 0x357   :  { %5005 = vst [vmem:[#allocation17_spill] sm:$0xff] %v4474_v32  ;;  %v1701_v32 = vsel %vm1699_vm8, 0.0, %v4216_v22 }
 0x358   :  { %v4476_v3 = vpop.permute.xlu0 %1439  ;;  %v1718_v34 = vsel %vm1716_vm9, %v1701_v32, %v4285_v12 }
 0x359   :  { %5006 = vst [vmem:[#allocation7_spill] sm:$0xff] %v4476_v3 }
 0x35a   :  { %v4478_v52 = vpop.permute.xlu1 %1441 }
 0x35b   :  { %5007 = vst [vmem:[#allocation18_spill] sm:$0xff] %v4478_v52  ;;  %v1700_v52 = vsel %vm1699_vm8, 0.0, %v4209_v60  ;;  %v1702_v60 = vsel %vm1699_vm8, %v4096_v30, %v4223_v29 }
 0x35c   :  { %v4480_v59 = vpop.permute.xlu0 %1475  ;;  %v1717_v33 = vsel %vm1716_vm9, %v1700_v52, %v4273_v35  ;;  %v1703_v35 = vsel %vm1699_vm8, %v4102_v6, %v4233_v44  ;;  %v1719_v52 = vsel %vm1716_vm9, %v1702_v60, %v4289_v54 }
 0x35d   :  { %v1734_v12 = vsel %vm1733_vm10, %v1717_v33, %v4365_v42  ;;  %v1720_v30 = vsel %vm1716_vm9, %v1703_v35, %v4301_v46  ;;  %v1736_v6 = vsel %vm1733_vm10, %v1719_v52, %v4375_v57  ;;  %v1705_v52 = vsel %vm1699_vm8, %v4114_v28, %v4249_v37 }
 0x35e   :  { %v4482_v1 = vpop.permute.xlu1 %1477  ;;  %v1751_v29 = vsel %vm1750_vm11, %v1734_v12, %v4407_v21  ;;  %v1737_v44 = vsel %vm1733_vm10, %v1720_v30, %v4381_v51  ;;  %v1753_v60 = vsel %vm1750_vm11, %v1736_v6, %v4417_v45  ;;  %v1706_v28 = vsel %vm1699_vm8, %v4120_v38, %v4257_v0 }
 0x35f   :  { %v1768_v42 = vsel %vm1767_vm12, %v1751_v29, %v1604_v19  ;;  %v1754_v54 = vsel %vm1750_vm11, %v1737_v44, %v4423_v4  ;;  %v1770_v21 = vsel %vm1767_vm12, %v1753_v60, %v1608_v24  ;;  %v1722_v29 = vsel %vm1716_vm9, %v1705_v52, %v4335_v61 }
 0x360   :  { %v1480_v55 = vpop.permute.xlu0 %1479  ;;  %v1771_v33 = vsel %vm1767_vm12, %v1754_v54, %v1610_v14  ;;  %v1739_v6 = vsel %vm1733_vm10, %v1722_v29, %v4394_v25  ;;  %v1707_v37 = vsel %vm1699_vm8, %v4126_v63, %v4263_v15 }
 0x361   :  { %v4487_v20 = vsel %vm1716_vm9, %v1710_v41, %v1480_v55  ;;  %v1735_v41 = vsel %vm1733_vm10, %v1718_v34, %v4371_v11  ;;  %v1724_v25 = vsel %vm1716_vm9, %v1707_v37, %v4355_v36  ;;  %v1709_v37 = vsel %vm1699_vm8, %v4190_v26, %v4430_v10 }
 0x362   :  { %v4489_v48 = vpop.permute.xlu1 %1481  ;;  %v1752_v22 = vsel %vm1750_vm11, %v1735_v41, %v4413_v50  ;;  %v1741_v0 = vsel %vm1733_vm10, %v1724_v25, %v4403_v13  ;;  %v1711_v26 = vsel %vm1699_vm8, %v4247_v8, %v4438_v31 }
 0x363   :  { %v1769_v32 = vsel %vm1767_vm12, %v1752_v22, %v1606_v9  ;;  %v1758_v36 = vsel %vm1750_vm11, %v1741_v0, %v4457_v16  ;;  %v5008_v0 = vld [vmem:[#allocation30_spill] sm:$0xff] }
 0x364   :  { %v4491_v23 = vpop.permute.xlu0 %1611 }
 0x366   :  { %v1614_v3 = vpop.permute.xlu1 %1613 }
 0x368   :  { %v4495_v7 = vpop.permute.xlu0 %1615 }
 0x36a   :  { %v4499_v58 = vpop.permute.xlu1 %1617 }
 0x36c   :  { %v1652_v55 = vpop.permute.xlu0 %1651 }
 0x36d   :  { %v1785_v46 = vsel %vm1784_vm13, %v1768_v42, %v1652_v55 }
 0x36e   :  { %v1654_v11 = vpop.permute.xlu1 %1653 }
 0x36f   :  { %v1786_v50 = vsel %vm1784_vm13, %v1769_v32, %v1654_v11 }
 0x370   :  { %v1656_v9 = vpop.permute.xlu0 %1655  ;;  %v1838_v34 = vcombine.low %v1785_v46, %v1786_v50  ;;  %v1704_v50 = vsel %vm1699_vm8, %v4108_v53, %v4241_v43 }
 0x371   :  { %v1787_v41 = vsel %vm1784_vm13, %v1770_v21, %v1656_v9  ;;  %v1721_v42 = vsel %vm1716_vm9, %v1704_v50, %v4315_v18  ;;  %v1756_v9 = vsel %vm1750_vm11, %v1739_v6, %v4447_v39  ;;  %v1723_v18 = vsel %vm1716_vm9, %v1706_v28, %v4343_v17 }
 0x372   :  { %v1658_v57 = vpop.permute.xlu1 %1657  ;;  %v1846_v45 = vrot.slane %v1838_v34, %v3297_v5  ;;  %v1738_v53 = vsel %vm1733_vm10, %v1721_v42, %v4387_v49  ;;  %v1773_v43 = vsel %vm1767_vm12, %v1756_v9, %v1614_v3  ;;  %v1740_v63 = vsel %vm1733_vm10, %v1723_v18, %v4398_v2 }
 0x373   :  { %v1788_v51 = vsel %vm1784_vm13, %v1771_v33, %v1658_v57  ;;  %v1755_v39 = vsel %vm1750_vm11, %v1738_v53, %v4442_v62  ;;  %v1757_v17 = vsel %vm1750_vm11, %v1740_v63, %v4451_v27  ;;  %v1775_v2 = vsel %vm1767_vm12, %v1758_v36, %v4499_v58  ;;  %v5009_v36 = vld [vmem:[#allocation17_spill] sm:$0xff] }
 0x374   :  { %v1839_v19 = vcombine.low %v1787_v41, %v1788_v51  ;;  %v4539_v22 = vpop.permute.xlu0 %1483  ;;  %v1772_v15 = vsel %vm1767_vm12, %v1755_v39, %v4491_v23  ;;  %v1774_v3 = vsel %vm1767_vm12, %v1757_v17, %v4495_v7 }
 0x376   :  { %v4541_v35 = vpop.permute.xlu1 %1485  ;;  %v1853_v4 = vrot.slane %v1839_v19, %v3297_v5 }
 0x378   :  { %v4545_v55 = vpop.permute.xlu0 %1487  ;;  %v1854_v24 = vcombine.low %v1846_v45, %v1853_v4 }
 0x37a   :  { %v4547_v14 = vpop.permute.xlu1 %1489  ;;  %2547 = vmatprep.mubr.msk.f32.mxu1 %vm1906_vm14, %v1854_v24 }
 0x37c   :  { %v4550_v12 = vpop.permute.xlu0 %1523 }
 0x37e   :  { %v1526_v32 = vpop.permute.xlu1 %1525 }
 0x380   :  { %v4552_v11 = vpop.permute.xlu0 %1527 }
 0x382   :  { %v4557_v30 = vpop.permute.xlu1 %1529 }
 0x384   :  { %v1660_v44 = vpop.permute.xlu0 %1659 }
 0x385   :  { %v1789_v62 = vsel %vm1784_vm13, %v1772_v15, %v1660_v44  ;;  %v1712_v15 = vsel %vm1699_vm8, %v5008_v0, %v4472_v56 }
 0x386   :  { %v1662_v61 = vpop.permute.xlu1 %1661 }
 0x387   :  { %v1790_v38 = vsel %vm1784_vm13, %v1773_v43, %v1662_v61  ;;  %v1726_v43 = vsel %vm1716_vm9, %v1709_v37, %v4482_v1  ;;  %v1708_v61 = vsel %vm1699_vm8, %v4132_v40, %v4426_v47  ;;  %v1728_v40 = vsel %vm1716_vm9, %v1711_v26, %v4489_v48 }
 0x388   :  { %v1664_v49 = vpop.permute.xlu0 %1663  ;;  %v1855_v60 = vcombine.low %v1789_v62, %v1790_v38  ;;  %v1743_v18 = vsel %vm1733_vm10, %v1726_v43, %v1526_v32  ;;  %v1725_v39 = vsel %vm1716_vm9, %v1708_v61, %v4480_v59  ;;  %v1744_v59 = vsel %vm1733_vm10, %v4487_v20, %v4552_v11  ;;  %v5010_v62 = vld [vmem:[#allocation15_spill] sm:$0xff] }
 0x389   :  { %v1791_v54 = vsel %vm1784_vm13, %v1774_v3, %v1664_v49  ;;  %v1742_v10 = vsel %vm1733_vm10, %v1725_v39, %v4550_v12  ;;  %v1745_v8 = vsel %vm1733_vm10, %v1728_v40, %v4557_v30  ;;  %v1713_v20 = vsel %vm1699_vm8, %v5010_v62, %v5009_v36 }
 0x38a   :  { %v1666_v13 = vpop.permute.xlu1 %1665  ;;  %v1863_v27 = vrot.slane %v1855_v60, %v3297_v5  ;;  %v1729_v60 = vsel %vm1716_vm9, %v1712_v15, %v4539_v22  ;;  %v1730_v56 = vsel %vm1716_vm9, %v1713_v20, %v4541_v35 }
 0x38b   :  { %v1792_v23 = vsel %vm1784_vm13, %v1775_v2, %v1666_v13 }
 0x38c   :  { %v1856_v46 = vcombine.low %v1791_v54, %v1792_v23  ;;  %v1532_v21 = vpop.permute.xlu0 %1531 }
 0x38d   :  { %v1746_v23 = vsel %vm1733_vm10, %v1729_v60, %v1532_v21 }
 0x38e   :  { %v1870_v16 = vrot.slane %v1856_v46, %v3297_v5  ;;  %v1534_v33 = vpop.permute.xlu1 %1533 }
 0x38f   :  { %v1747_v46 = vsel %vm1733_vm10, %v1730_v56, %v1534_v33 }
 0x390   :  { %v1871_v34 = vcombine.low %v1863_v27, %v1870_v16  ;;  %v4605_v57 = vpop.permute.xlu0 %1535 }
 0x392   :  { %v4607_v7 = vpop.permute.xlu1 %1537  ;;  %2548 = vmatmul.mubr.msk.f32.vlgmr.msra.gmra.mrb[0].mxu1 %vm1906_vm14, %v1871_v34  ;;  %v5011_v34 = vld [vmem:[#allocation7_spill] sm:$0xff] }
 0x394   :  { %v1572_v58 = vpop.permute.xlu0 %1571 }
 0x395   :  { %v1759_v47 = vsel %vm1750_vm11, %v1742_v10, %v1572_v58  ;;  %v5012_v58 = vld [vmem:[#allocation5_spill] sm:$0xff] }
 0x396   :  { %v1574_v41 = vpop.permute.xlu1 %1573 }
 0x397   :  { %v1760_v38 = vsel %vm1750_vm11, %v1743_v18, %v1574_v41  ;;  %v1714_v41 = vsel %vm1699_vm8, %v5012_v58, %v5011_v34 }
 0x398   :  { %v1576_v51 = vpop.permute.xlu0 %1575  ;;  %v1731_v37 = vsel %vm1716_vm9, %v1714_v41, %v4545_v55  ;;  %v2274_v41 = vld [vmem:[#allocation2] sm:$0xff] }
 0x399   :  { %v1761_v48 = vsel %vm1750_vm11, %v1744_v59, %v1576_v51  ;;  %v5013_v51 = vld [vmem:[#allocation18_spill] sm:$0xff] }
 0x39a   :  { %v1578_v19 = vpop.permute.xlu1 %1577 }
 0x39b   :  { %v1762_v49 = vsel %vm1750_vm11, %v1745_v8, %v1578_v19  ;;  %v5014_v19 = vld [vmem:[#allocation28_spill] sm:$0xff] }
 0x39c   :  { %v1580_v45 = vpop.permute.xlu0 %1579  ;;  %v1715_v22 = vsel %vm1699_vm8, %v5014_v19, %v5013_v51  ;;  %v2275_v51 = vld [vmem:[#allocation2 + $0x8] sm:$0xff] }
 0x39d   :  { %v1763_v35 = vsel %vm1750_vm11, %v1746_v23, %v1580_v45  ;;  %v1732_v43 = vsel %vm1716_vm9, %v1715_v22, %v4547_v14  ;;  %v2598_v19 = vpack.c.bf16 %v2275_v51, %v2274_v41  ;;  %v2276_v22 = vld [vmem:[#allocation2 + $0x10] sm:$0xff] }
 0x39e   :  { %v1582_v4 = vpop.permute.xlu1 %1581 }
 0x39f   :  { %2599 = vmatprep.subr.bf16.mxu0 %v2598_v19 }
 0x3a0   :  { %v4610_v24 = vpop.permute.xlu0 %1583  ;;  %2601 = vmatpush3.bf16.msra.mxu0 %v2598_v19 }
 0x3a2   :  { %v4612_v52 = vpop.permute.xlu1 %1585 }
 0x3a4   :  { %v1620_v29 = vpop.permute.xlu0 %1619 }
 0x3a5   :  { %v1776_v31 = vsel %vm1767_vm12, %v1759_v47, %v1620_v29  ;;  %v1764_v29 = vsel %vm1750_vm11, %v1747_v46, %v1582_v4  ;;  %v1748_v4 = vsel %vm1733_vm10, %v1731_v37, %v4605_v57  ;;  %v2280_v37 = vld [vmem:[#allocation2 + $0x30] sm:$0xff] }
 0x3a6   :  { %v1622_v50 = vpop.permute.xlu1 %1621  ;;  %v1765_v39 = vsel %vm1750_vm11, %v1748_v4, %v4610_v24 }
 0x3a7   :  { %v1777_v1 = vsel %vm1767_vm12, %v1760_v38, %v1622_v50 }
 0x3a8   :  { %v1624_v6 = vpop.permute.xlu0 %1623 }
 0x3a9   :  { %v1778_v11 = vsel %vm1767_vm12, %v1761_v48, %v1624_v6 }
 0x3aa   :  { %v1626_v44 = vpop.permute.xlu1 %1625 }
 0x3ab   :  { %v1779_v30 = vsel %vm1767_vm12, %v1762_v49, %v1626_v44 }
 0x3ac   :  { %v1628_v42 = vpop.permute.xlu0 %1627 }
 0x3ad   :  { %v1780_v50 = vsel %vm1767_vm12, %v1763_v35, %v1628_v42  ;;  %v1749_v42 = vsel %vm1733_vm10, %v1732_v43, %v4607_v7  ;;  %v2277_v35 = vld [vmem:[#allocation2 + $0x18] sm:$0xff] }
 0x3ae   :  { %v1630_v9 = vpop.permute.xlu1 %1629  ;;  %v1766_v55 = vsel %vm1750_vm11, %v1749_v42, %v4612_v52  ;;  %v5015_v52 = vmov 0.0  }
 0x3af   :  { %v1781_v21 = vsel %vm1767_vm12, %v1764_v29, %v1630_v9  ;;  %2189 = vrot.lane.b32.xlu0 %v5015_v52, %s2670_s3  ;;  %v2602_v29 = vpack.c.bf16 %v2277_v35, %v2276_v22 }
 0x3b0   :  { %v1632_v28 = vpop.permute.xlu0 %1631 }
 0x3b1   :  { %v1782_v14 = vsel %vm1767_vm12, %v1765_v39, %v1632_v28  ;;  %v2461_v28 = vld [vmem:[%s4872_s4] ss:$0 sm:$0xff]  ;;  %2603 = vmatprep.subr.bf16.mxu0 %v2602_v29 }
 0x3b2   :  { %v1634_v53 = vpop.permute.xlu1 %1633  ;;  %2605 = vmatpush3.bf16.msra.mxu0 %v2602_v29 }
 0x3b3   :  { %v1783_v38 = vsel %vm1767_vm12, %v1766_v55, %v1634_v53 }
 0x3b4   :  { %v1668_v25 = vpop.permute.xlu0 %1667 }
 0x3b5   :  { %v1793_v17 = vsel %vm1784_vm13, %v1776_v31, %v1668_v25 }
 0x3b6   :  { %v1670_v63 = vpop.permute.xlu1 %1669 }
 0x3b7   :  { %v1794_v32 = vsel %vm1784_vm13, %v1777_v1, %v1670_v63 }
 0x3b8   :  { %v1672_v12 = vpop.permute.xlu0 %1671  ;;  %v1872_v3 = vcombine.low %v1793_v17, %v1794_v32 }
 0x3b9   :  { %v1795_v13 = vsel %vm1784_vm13, %v1778_v11, %v1672_v12 }
 0x3ba   :  { %v1674_v2 = vpop.permute.xlu1 %1673  ;;  %v1880_v33 = vrot.slane %v1872_v3, %v3297_v5 }
 0x3bb   :  { %v1796_v54 = vsel %vm1784_vm13, %v1779_v30, %v1674_v2 }
 0x3bc   :  { %v1873_v27 = vcombine.low %v1795_v13, %v1796_v54  ;;  %v1676_v16 = vpop.permute.xlu0 %1675 }
 0x3bd   :  { %v1797_v61 = vsel %vm1784_vm13, %v1780_v50, %v1676_v16 }
 0x3be   :  { %v1887_v6 = vrot.slane %v1873_v27, %v3297_v5  ;;  %v1678_v44 = vpop.permute.xlu1 %1677 }
 0x3bf   :  { %v1798_v45 = vsel %vm1784_vm13, %v1781_v21, %v1678_v44  ;;  %v2278_v21 = vld [vmem:[#allocation2 + $0x20] sm:$0xff] }
 0x3c0   :  { %v1888_v9 = vcombine.low %v1880_v33, %v1887_v6  ;;  %v1889_v18 = vcombine.low %v1797_v61, %v1798_v45  ;;  %v1680_v25 = vpop.permute.xlu0 %1679  ;;  %v2279_v33 = vld [vmem:[#allocation2 + $0x28] sm:$0xff] }
 0x3c1   :  { %v1799_v57 = vsel %vm1784_vm13, %v1782_v14, %v1680_v25  ;;  %v2606_v6 = vpack.c.bf16 %v2279_v33, %v2278_v21 }
 0x3c2   :  { %v1682_v26 = vpop.permute.xlu1 %1681  ;;  %2550 = vmatprep.mubr.msk.f32.mxu1 %vm1906_vm14, %v1888_v9  ;;  %v1897_v1 = vrot.slane %v1889_v18, %v3297_v5 }
 0x3c3   :  { %v1800_v7 = vsel %vm1784_vm13, %v1783_v38, %v1682_v26  ;;  %2607 = vmatprep.subr.bf16.mxu0 %v2606_v6 }
 0x3c4   :  { %v1890_v10 = vcombine.low %v1799_v57, %v1800_v7  ;;  %2609 = vmatpush3.bf16.msra.mxu0 %v2606_v6  ;;  %v2083_v43 = vpop.permute.xlu0 %2082 }
 0x3c5   :  { %2565 = vmatprep.subr.mxu0 %v2280_v37 }
 0x3c6   :  { %v1904_v63 = vrot.slane %v1890_v10, %v3297_v5 }
 0x3c8   :  { %v1905_v24 = vcombine.low %v1897_v1, %v1904_v63  ;;  %2566 = vmatpush3.msra.mxu0 %v2280_v37 }
 0x3ca   :  { %2551 = vmatmul.mubr.msk.f32.gmra.mrb[2].mxu1 %vm1906_vm14, %v1905_v24 }
 0x421   :  { %v4783_v61 = vpop.permute.xlu0 %2189 }
 0x465   :  { %v2549_v53 = vpop.f32.mrb[0].mxu1 }
 0x466   :  { %v1987_v40 = vadd.f32 %v2549_v53, %v2461_v28  ;;  %v1981_v47 = vpop.f32.mrb[1].mxu1 }
 0x467   :  { %v1982_v31 = vadd.f32 %v2461_v28, %v1981_v47 }
 0x468   :  { %v2001_v32 = vmax.f32 %v1987_v40, 0.0 }
 0x469   :  { %v2000_v0 = vmax.f32 %v1982_v31, 0.0 }
 0x46a   :  { %v2025_v59 = vcombine.high %v2001_v32, %v2001_v32  ;;  %v2032_v8 = vrot.slane %v2001_v32, %v3297_v5 }
 0x46b   :  { %v2015_v15 = vrot.slane %v2000_v0, %v3297_v5  ;;  %v2008_v49 = vcombine.high %v2000_v0, %v2000_v0 }
 0x46c   :  { %2177 = vrot.lane.b32.xlu0 %v2032_v8, %s2670_s3  ;;  %2088 = vrot.lane.b32.xlu1 %v2032_v8, %s2655_s12  ;;  %v2039_v12 = vrot.slane %v2025_v59, %v3297_v5  ;;  %v4707_v48 = vcombine.high %v2032_v8, %v2032_v8 }
 0x46d   :  { %v2022_v17 = vrot.slane %v2008_v49, %v3297_v5  ;;  %v4721_v36 = vcombine.high %v2015_v15, %v2015_v15 }
 0x46e   :  { %v4729_v62 = vcombine.high %v2039_v12, %v2039_v12 }
 0x46f   :  { %v4735_v20 = vcombine.high %v2022_v17, %v2022_v17 }
 0x470   :  { %2131 = vrot.lane.b32.xlu1 %v2032_v8, %s2671_s23  ;;  %2090 = vrot.lane.b32.xlu0 %v2039_v12, %s2655_s12 }
 0x474   :  { %2110 = vrot.lane.b32.xlu0 %v4707_v48, %s2664_s0  ;;  %2084 = vrot.lane.b32.xlu1 %v2015_v15, %s2655_s12 }
 0x478   :  { %2133 = vrot.lane.b32.xlu0 %v2039_v12, %s2671_s23  ;;  %2127 = vrot.lane.b32.xlu1 %v2015_v15, %s2671_s23 }
 0x47c   :  { %2201 = vrot.lane.b32.xlu0 %v4707_v48, %s2666_s8  ;;  %2155 = vrot.lane.b32.xlu1 %v4707_v48, %s2665_s2 }
 0x480   :  { %2179 = vrot.lane.b32.xlu1 %v2039_v12, %s2670_s3  ;;  %2086 = vrot.lane.b32.xlu0 %v2022_v17, %s2655_s12 }
 0x484   :  { %2151 = vrot.lane.b32.xlu1 %v4721_v36, %s2665_s2  ;;  %2106 = vrot.lane.b32.xlu0 %v4721_v36, %s2664_s0 }
 0x488   :  { %2175 = vrot.lane.b32.xlu1 %v2022_v17, %s2670_s3  ;;  %2129 = vrot.lane.b32.xlu0 %v2022_v17, %s2671_s23 }
 0x48c   :  { %2112 = vrot.lane.b32.xlu1 %v4729_v62, %s2664_s0  ;;  %2157 = vrot.lane.b32.xlu0 %v4729_v62, %s2665_s2 }
 0x490   :  { %2203 = vrot.lane.b32.xlu1 %v4729_v62, %s2666_s8  ;;  %2153 = vrot.lane.b32.xlu0 %v4735_v20, %s2665_s2 }
 0x494   :  { %2108 = vrot.lane.b32.xlu1 %v4735_v20, %s2664_s0 }
 0x498   :  { %2199 = vrot.lane.b32.xlu1 %v4735_v20, %s2666_s8 }
 0x49d   :  { %v2552_v11 = vpop.f32.mrb[2].mxu1 }
 0x49e   :  { %v1997_v30 = vadd.f32 %v2552_v11, %v2461_v28  ;;  %v1991_v3 = vpop.f32.mrb[3].mxu1 }
 0x49f   :  { %v1992_v2 = vadd.f32 %v2461_v28, %v1991_v3 }
 0x4a0   :  { %v2003_v60 = vmax.f32 %v1997_v30, 0.0 }
 0x4a1   :  { %v2002_v13 = vmax.f32 %v1992_v2, 0.0 }
 0x4a2   :  { %v2066_v56 = vrot.slane %v2003_v60, %v3297_v5  ;;  %v2059_v23 = vcombine.high %v2003_v60, %v2003_v60 }
 0x4a3   :  { %v2049_v54 = vrot.slane %v2002_v13, %v3297_v5  ;;  %v2042_v16 = vcombine.high %v2002_v13, %v2002_v13 }
 0x4a4   :  { %2185 = vrot.lane.b32.xlu0 %v2066_v56, %s2670_s3  ;;  %2096 = vrot.lane.b32.xlu1 %v2066_v56, %s2655_s12  ;;  %v2074_v46 = vcombine.high %v2066_v56, %v2066_v56  ;;  %v2073_v27 = vrot.slane %v2059_v23, %v3297_v5 }
 0x4a5   :  { %v2056_v34 = vrot.slane %v2042_v16, %v3297_v5  ;;  %v4761_v58 = vcombine.high %v2049_v54, %v2049_v54 }
 0x4a6   :  { %v2075_v44 = vcombine.high %v2073_v27, %v2073_v27 }
 0x4a7   :  { %v4769_v50 = vcombine.high %v2056_v34, %v2056_v34 }
 0x4a8   :  { %2139 = vrot.lane.b32.xlu1 %v2066_v56, %s2671_s23  ;;  %2181 = vrot.lane.b32.xlu0 %v2049_v54, %s2670_s3  ;;  %v2224_v56 = vsel %vm2223_vm15, 0.0, %v2083_v43 }
 0x4ac   :  { %2118 = vrot.lane.b32.xlu0 %v2074_v46, %s2664_s0  ;;  %2092 = vrot.lane.b32.xlu1 %v2049_v54, %s2655_s12 }
 0x4b0   :  { %2141 = vrot.lane.b32.xlu0 %v2073_v27, %s2671_s23  ;;  %2135 = vrot.lane.b32.xlu1 %v2049_v54, %s2671_s23 }
 0x4b4   :  { %2209 = vrot.lane.b32.xlu0 %v2074_v46, %s2666_s8  ;;  %2163 = vrot.lane.b32.xlu1 %v2074_v46, %s2665_s2 }
 0x4b8   :  { %2187 = vrot.lane.b32.xlu1 %v2073_v27, %s2670_s3  ;;  %2094 = vrot.lane.b32.xlu0 %v2056_v34, %s2655_s12 }
 0x4bc   :  { %2159 = vrot.lane.b32.xlu1 %v4761_v58, %s2665_s2  ;;  %2114 = vrot.lane.b32.xlu0 %v4761_v58, %s2664_s0 }
 0x4c0   :  { %2183 = vrot.lane.b32.xlu1 %v2056_v34, %s2670_s3  ;;  %2137 = vrot.lane.b32.xlu0 %v2056_v34, %s2671_s23  ;;  %v5016_v34 = vld [vmem:[#allocation6_spill] sm:$0xff] }
 0x4c4   :  { %2205 = vrot.lane.b32.xlu0 %v4761_v58, %s2666_s8  ;;  %2116 = vrot.lane.b32.xlu1 %v4769_v50, %s2664_s0 }
 0x4c8   :  { %2165 = vrot.lane.b32.xlu0 %v2075_v44, %s2665_s2  ;;  %2207 = vrot.lane.b32.xlu1 %v4769_v50, %s2666_s8 }
 0x4cc   :  { %2161 = vrot.lane.b32.xlu0 %v4769_v50, %s2665_s2  ;;  %2211 = vrot.lane.b32.xlu1 %v2075_v44, %s2666_s8 }
 0x4d0   :  { %2213 = vrot.lane.b32.xlu0 %v5015_v52, %s2666_s8 }
 0x4de   :  { %v2089_v45 = vpop.permute.xlu1 %2088  ;;  %v2178_v4 = vpop.permute.xlu0 %2177 }
 0x4df   :  { %v2227_v35 = vsel %vm2223_vm15, %v4735_v20, %v2089_v45 }
 0x4e2   :  { %v2132_v42 = vpop.permute.xlu1 %2131  ;;  %v4785_v9 = vpop.permute.xlu0 %2090 }
 0x4e6   :  { %v2085_v18 = vpop.permute.xlu1 %2084  ;;  %v2111_v25 = vpop.permute.xlu0 %2110 }
 0x4e7   :  { %v2225_v13 = vsel %vm2223_vm15, 0.0, %v2085_v18  ;;  %v2235_v44 = vsel %vm1699_vm8, %v2227_v35, %v2111_v25 }
 0x4ea   :  { %v2128_v39 = vpop.permute.xlu1 %2127  ;;  %v2134_v55 = vpop.permute.xlu0 %2133 }
 0x4eb   :  { %v2244_v43 = vsel %vm2240_vm0, %v2235_v44, %v2134_v55 }
 0x4ee   :  { %v2156_v14 = vpop.permute.xlu1 %2155  ;;  %v2202_v26 = vpop.permute.xlu0 %2201 }
 0x4f2   :  { %v2180_v38 = vpop.permute.xlu1 %2179  ;;  %v2087_v7 = vpop.permute.xlu0 %2086 }
 0x4f3   :  { %v2226_v30 = vsel %vm2223_vm15, %v4721_v36, %v2087_v7  ;;  %v2232_v36 = vsel %vm1699_vm8, %v2224_v56, %v5016_v34 }
 0x4f4   :  { %v2241_v51 = vsel %vm2240_vm0, %v2232_v36, %v2128_v39 }
 0x4f6   :  { %v2152_v57 = vpop.permute.xlu1 %2151  ;;  %v2107_v1 = vpop.permute.xlu0 %2106 }
 0x4f7   :  { %v2233_v54 = vsel %vm1699_vm8, %v2225_v13, %v2107_v1  ;;  %v2249_v19 = vsel %vm1716_vm9, %v2241_v51, %v2152_v57 }
 0x4fa   :  { %v2176_v10 = vpop.permute.xlu1 %2175  ;;  %v2130_v24 = vpop.permute.xlu0 %2129 }
 0x4fb   :  { %v2242_v23 = vsel %vm2240_vm0, %v2233_v54, %v2130_v24  ;;  %v2258_v29 = vsel %vm2257_vm1, %v2249_v19, %v2176_v10 }
 0x4fe   :  { %v4787_v63 = vpop.permute.xlu1 %2112  ;;  %v2158_v28 = vpop.permute.xlu0 %2157 }
 0x4ff   :  { %v2252_v18 = vsel %vm1716_vm9, %v2244_v43, %v2158_v28  ;;  %v2228_v28 = vsel %vm2223_vm15, %v4707_v48, %v4785_v9 }
 0x502   :  { %v2204_v52 = vpop.permute.xlu1 %2203  ;;  %v2154_v40 = vpop.permute.xlu0 %2153 }
 0x503   :  { %v2250_v41 = vsel %vm1716_vm9, %v2242_v23, %v2154_v40 }
 0x504   :  { %v2259_v21 = vsel %vm2257_vm1, %v2250_v41, %v2178_v4 }
 0x505   :  { %v2267_v39 = vsel %vm1733_vm10, %v2259_v21, %v2202_v26 }
 0x506   :  { %v2109_v53 = vpop.permute.xlu1 %2108 }
 0x507   :  { %v2234_v60 = vsel %vm1699_vm8, %v2226_v30, %v2109_v53 }
 0x508   :  { %v2243_v46 = vsel %vm2240_vm0, %v2234_v60, %v2132_v42 }
 0x509   :  { %v2251_v22 = vsel %vm1716_vm9, %v2243_v46, %v2156_v14 }
 0x50a   :  { %v2200_v47 = vpop.permute.xlu1 %2199  ;;  %v2260_v42 = vsel %vm2257_vm1, %v2251_v22, %v2180_v38 }
 0x50b   :  { %v2266_v37 = vsel %vm1733_vm10, %v2258_v29, %v2200_v47  ;;  %v2268_v4 = vsel %vm1733_vm10, %v2260_v42, %v2204_v52  ;;  %v2236_v47 = vsel %vm1699_vm8, %v2228_v28, %v4787_v63 }
 0x50c   :  { %v2296_v14 = vcombine.low %v2266_v37, %v2267_v39 }
 0x50e   :  { %v2304_v38 = vrot.slane %v2296_v14, %v3297_v5 }
 0x516   :  { %v2097_v32 = vpop.permute.xlu1 %2096  ;;  %v4789_v59 = vpop.permute.xlu0 %2185 }
 0x517   :  { %v2231_v52 = vsel %vm2223_vm15, %v4769_v50, %v2097_v32 }
 0x51a   :  { %v2140_v8 = vpop.permute.xlu1 %2139  ;;  %v2182_v31 = vpop.permute.xlu0 %2181 }
 0x51b   :  { %v2261_v20 = vsel %vm2257_vm1, %v2252_v18, %v2182_v31 }
 0x51e   :  { %v2093_v12 = vpop.permute.xlu1 %2092  ;;  %v2119_v0 = vpop.permute.xlu0 %2118 }
 0x51f   :  { %v2239_v31 = vsel %vm1699_vm8, %v2231_v52, %v2119_v0 }
 0x522   :  { %v2136_v15 = vpop.permute.xlu1 %2135  ;;  %v2142_v49 = vpop.permute.xlu0 %2141 }
 0x523   :  { %v2248_v48 = vsel %vm2240_vm0, %v2239_v31, %v2142_v49 }
 0x526   :  { %v2164_v17 = vpop.permute.xlu1 %2163  ;;  %v4791_v11 = vpop.permute.xlu0 %2209 }
 0x52a   :  { %v4795_v3 = vpop.permute.xlu1 %2187  ;;  %v2095_v2 = vpop.permute.xlu0 %2094 }
 0x52b   :  { %v2230_v25 = vsel %vm2223_vm15, %v4761_v58, %v2095_v2  ;;  %v2229_v58 = vsel %vm2223_vm15, %v4729_v62, %v2093_v12  ;;  %v2245_v2 = vsel %vm2240_vm0, %v2236_v47, %v2136_v15 }
 0x52e   :  { %v2160_v27 = vpop.permute.xlu1 %2159  ;;  %v2115_v16 = vpop.permute.xlu0 %2114 }
 0x52f   :  { %v2237_v30 = vsel %vm1699_vm8, %v2229_v58, %v2115_v16  ;;  %v2253_v62 = vsel %vm1716_vm9, %v2245_v2, %v2160_v27 }
 0x532   :  { %v2184_v33 = vpop.permute.xlu1 %2183  ;;  %v2138_v6 = vpop.permute.xlu0 %2137 }
 0x533   :  { %v2246_v9 = vsel %vm2240_vm0, %v2237_v30, %v2138_v6  ;;  %v2262_v12 = vsel %vm2257_vm1, %v2253_v62, %v2184_v33 }
 0x536   :  { %v2117_v45 = vpop.permute.xlu1 %2116  ;;  %v2206_v57 = vpop.permute.xlu0 %2205 }
 0x537   :  { %v2269_v7 = vsel %vm1733_vm10, %v2261_v20, %v2206_v57  ;;  %v2238_v55 = vsel %vm1699_vm8, %v2230_v25, %v2117_v45 }
 0x538   :  { %v2297_v10 = vcombine.low %v2268_v4, %v2269_v7  ;;  %v2247_v53 = vsel %vm2240_vm0, %v2238_v55, %v2140_v8 }
 0x539   :  { %v2255_v8 = vsel %vm1716_vm9, %v2247_v53, %v2164_v17 }
 0x53a   :  { %v2311_v1 = vrot.slane %v2297_v10, %v3297_v5  ;;  %v2208_v26 = vpop.permute.xlu1 %2207  ;;  %v2166_v24 = vpop.permute.xlu0 %2165  ;;  %v2264_v56 = vsel %vm2257_vm1, %v2255_v8, %v4795_v3 }
 0x53b   :  { %v2256_v32 = vsel %vm1716_vm9, %v2248_v48, %v2166_v24  ;;  %v2270_v49 = vsel %vm1733_vm10, %v2262_v12, %v2208_v26 }
 0x53c   :  { %v2312_v40 = vcombine.low %v2304_v38, %v2311_v1  ;;  %v2265_v17 = vsel %vm2257_vm1, %v2256_v32, %v4783_v61 }
 0x53e   :  { %2567 = vmatprep.mubr.msk.f32.mxu0 %vm2330_vm2, %v2312_v40  ;;  %v2162_v50 = vpop.permute.xlu0 %2161  ;;  %v2212_v0 = vpop.permute.xlu1 %2211 }
 0x53f   :  { %v2254_v63 = vsel %vm1716_vm9, %v2246_v9, %v2162_v50  ;;  %v2272_v23 = vsel %vm1733_vm10, %v2264_v56, %v2212_v0 }
 0x540   :  { %v2263_v15 = vsel %vm2257_vm1, %v2254_v63, %v4789_v59 }
 0x541   :  { %v2271_v60 = vsel %vm1733_vm10, %v2263_v15, %v4791_v11  ;;  %v2466_v11 = vld [vmem:[%s4874_s6] ss:$0 sm:$0xff] }
 0x542   :  { %v2313_v13 = vcombine.low %v2270_v49, %v2271_v60  ;;  %v2214_v54 = vpop.permute.xlu0 %2213 }
 0x543   :  { %v2273_v46 = vsel %vm1733_vm10, %v2265_v17, %v2214_v54 }
 0x544   :  { %v2314_v27 = vcombine.low %v2272_v23, %v2273_v46  ;;  %v2321_v59 = vrot.slane %v2313_v13, %v3297_v5 }
 0x546   :  { %v2328_v16 = vrot.slane %v2314_v27, %v3297_v5 }
 0x548   :  { %v2329_v34 = vcombine.low %v2321_v59, %v2328_v16 }
 0x54a   :  { %2568 = vmatmul.mubr.msk.f32.vlgmr.msra.gmra.mrb[8].mxu0 %vm2330_vm2, %v2329_v34 }
 0x61d   :  { %v2569_v3 = vpop.f32.mrb[8].mxu0 }
 0x61e   :  { %v2401_v36 = vpop.f32.mrb[9].mxu0  ;;  %v2407_v41 = vadd.f32 %v2569_v3, %v2466_v11 }
 0x61f   :  { %v2402_v61 = vadd.f32 %v2466_v11, %v2401_v36 }
 0x620   :  { %v2411_v19 = vmax.f32 %v2407_v41, 0.0 }
 0x621   :  { %v2410_v51 = vmax.f32 %v2402_v61, 0.0 }
 0x623   :  { %2412 = vxpose.xlu1.b32.start [1/2] (short) (narrow) %v2410_v51, 8 }
 0x627   :  { %2413 = vxpose.xlu1.b32.end [2/2] (short) (narrow) %v2411_v19, 8 }
 0x6a3   :  { %v2428_v22 = vpop.trf.xlu1 }
 0x6a4   :  { %2445 = vst.msk [vmem:[%s4875_s7] sm:$0xf] %vm2444_vm3, %v2428_v22 }
 0x6a5   :  { %2450 = vsyncpa [#allocation3], 1 }

</bundles_post_ra>
